<compile_context>
chip_gen: v7x
topology: tpu7x:2x2x1
jax: 0.10.0
libtpu: 0.0.40
codegen_flags: <defaults>
</compile_context>

<pallas_src>
import jax
import jax.numpy as jnp
from jax.experimental import pallas as pl
from jax.experimental.pallas import tpu as pltpu


LANE = 128  # TPU lane width; channels are padded to a multiple of this.


def _round_up(x, m):
    return (x + m - 1) // m * m


# ----------------------------------------------------------------------------
# Kernel 1: fused folded-BN scale/bias -> optional ReLU -> 3x3 conv as a single
#           im2col matmul, plus per-channel [sum, sum_sq] stats output.
# ----------------------------------------------------------------------------
def _make_conv_kernel(nb, H, W, Cin_p, Cout_p, Ho, Wo, stride, relu,
                      compute_dtype):
    Hp, Wp = H + 2, W + 2

    def kernel(x_ref, w_ref, sc_ref, bi_ref, y_ref, st_ref):
        # Folded BN (+ optional ReLU) in f32 on the VPU (v5e has no bf16 VALU).
        z = x_ref[...].astype(jnp.float32) * sc_ref[0] + bi_ref[0]
        if relu:
            z = jnp.maximum(z, 0.0)

        # Re-zero the 1px spatial border: the conv's own zero padding happens
        # AFTER bn/relu in the torch graph, but the input arrives pre-padded.
        hh = jax.lax.broadcasted_iota(jnp.int32, (1, Hp, Wp, Cin_p), 1)
        ww = jax.lax.broadcasted_iota(jnp.int32, (1, Hp, Wp, Cin_p), 2)
        interior = (hh >= 1) & (hh <= H) & (ww >= 1) & (ww <= W)
        z = jnp.where(interior, z, 0.0)

        # im2col: one (nb*Ho*Wo, 9*Cin_p) @ (9*Cin_p, Cout_p) MXU matmul.
        taps = []
        for kh in range(3):
            for kw in range(3):
                t = z[:, kh:kh + (Ho - 1) * stride + 1:stride,
                         kw:kw + (Wo - 1) * stride + 1:stride, :]
                taps.append(t.reshape(nb * Ho * Wo, Cin_p))
        patches = jnp.concatenate(taps, axis=1).astype(compute_dtype)
        y = jnp.dot(patches, w_ref[...], preferred_element_type=jnp.float32)

        # Lane-dense store (last dim Cout_p is a multiple of 128).
        y_ref[...] = y.reshape(nb, Ho, Wo, Cout_p).astype(y_ref.dtype)

        # Per-channel sum / sum-of-squares for the NEXT BatchNorm's batch
        # statistics (reduction while the tile is already resident; saves a
        # full HBM pass over the activation in the wrapper).
        s1 = jnp.sum(y, axis=0, keepdims=True)
        s2 = jnp.sum(y * y, axis=0, keepdims=True)
        st_ref[0] = jnp.concatenate([s1, s2], axis=0)

    return kernel


def conv3x3_bn_fused(x_nhwc, w_hwio, scale, bias, *, stride=1, relu=False,
                     nb=1, compute_dtype=jnp.float32):
    """Fused per-channel scale/bias (+relu) + 3x3 conv (pad=1, no bias).

    x_nhwc : (N, H, W, Cin_p), Cin_p a multiple of 128 (zero channel padding).
    w_hwio : (3, 3, Cin_true, Cout_true) un-padded weights.
    scale, bias : (Cin_p,) folded-BN scale/bias (padded entries are 0).
    Returns (y, stats): y (N, Ho, Wo, Cout_p) f32,
                        stats (N//nb, 2, Cout_p) per-step [sum, sum_sq].
    """
    N, H, W, Cin_p = x_nhwc.shape
    assert Cin_p % LANE == 0 and N % nb == 0
    cin, cout = w_hwio.shape[2], w_hwio.shape[3]
    Cout_p = _round_up(cout, LANE)
    Ho = (H - 1) // stride + 1
    Wo = (W - 1) // stride + 1

    # Spatial zero-pad once in HBM (amortized over the whole grid) -> no
    # per-step pad scratch and no misaligned interior writes in the kernel.
    xp = jnp.pad(x_nhwc.astype(jnp.float32), ((0, 0), (1, 1), (1, 1), (0, 0)))

    # Channel-pad weights and flatten to the im2col layout (9*Cin_p, Cout_p).
    w_p = jnp.zeros((3, 3, Cin_p, Cout_p), compute_dtype)
    w_p = w_p.at[:, :, :cin, :cout].set(w_hwio.astype(compute_dtype))
    w2d = w_p.reshape(9 * Cin_p, Cout_p)

    sc = scale.reshape(1, Cin_p).astype(jnp.float32)
    bi = bias.reshape(1, Cin_p).astype(jnp.float32)

    kernel = _make_conv_kernel(nb, H, W, Cin_p, Cout_p, Ho, Wo, stride, relu,
                               compute_dtype)
    # Tuning hooks kept at safe defaults for this small demo:
    #  * raise `nb` to amortize per-step overhead on v5e/v6e,
    #  * for large images, tile Ho into row strips and set vmem_limit_bytes
    #    against the 64 MiB v7x budget,
    #  * compute_dtype=jnp.bfloat16 on v6e/v7x for ~2x MXU and half DMA bytes.
    return pl.pallas_call(
        kernel,
        out_shape=(jax.ShapeDtypeStruct((N, Ho, Wo, Cout_p), jnp.float32),
                   jax.ShapeDtypeStruct((N // nb, 2, Cout_p), jnp.float32)),
        grid_spec=pltpu.PrefetchScalarGridSpec(
            num_scalar_prefetch=0,
            grid=(N // nb,),
            in_specs=[
                pl.BlockSpec((nb, H + 2, W + 2, Cin_p), lambda n: (n, 0, 0, 0)),
                pl.BlockSpec((9 * Cin_p, Cout_p), lambda n: (0, 0)),
                pl.BlockSpec((1, Cin_p), lambda n: (0, 0)),
                pl.BlockSpec((1, Cin_p), lambda n: (0, 0)),
            ],
            out_specs=[
                pl.BlockSpec((nb, Ho, Wo, Cout_p), lambda n: (n, 0, 0, 0)),
                pl.BlockSpec((1, 2, Cout_p), lambda n: (n, 0, 0)),
            ],
        ),
        compiler_params=pltpu.CompilerParams(
            dimension_semantics=("parallel",)),  # batch steps are independent
    )(xp, w2d, sc, bi)


# ----------------------------------------------------------------------------
# Kernel 2: fused BN3 (folded scale/bias) + residual add.  The shortcut arrives
# already channel-zero-padded, so the output is written exactly once.
# ----------------------------------------------------------------------------
def _bn_add_kernel(y_ref, s_ref, sc_ref, bi_ref, o_ref):
    o_ref[...] = (y_ref[...] * sc_ref[0] + bi_ref[0]
                  + s_ref[...]).astype(o_ref.dtype)


def bn_add_shortcut(y_nhwc, shortcut_nhwc, scale, bias, *, nb=1):
    N, H, W, Cp = y_nhwc.shape
    assert shortcut_nhwc.shape == y_nhwc.shape
    assert Cp % LANE == 0 and N % nb == 0
    sc = scale.reshape(1, Cp).astype(jnp.float32)
    bi = bias.reshape(1, Cp).astype(jnp.float32)
    return pl.pallas_call(
        _bn_add_kernel,
        out_shape=jax.ShapeDtypeStruct((N, H, W, Cp), jnp.float32),
        grid_spec=pltpu.PrefetchScalarGridSpec(
            num_scalar_prefetch=0,
            grid=(N // nb,),
            in_specs=[
                pl.BlockSpec((nb, H, W, Cp), lambda n: (n, 0, 0, 0)),
                pl.BlockSpec((nb, H, W, Cp), lambda n: (n, 0, 0, 0)),
                pl.BlockSpec((1, Cp), lambda n: (0, 0)),
                pl.BlockSpec((1, Cp), lambda n: (0, 0)),
            ],
            out_specs=pl.BlockSpec((nb, H, W, Cp), lambda n: (n, 0, 0, 0)),
        ),
        compiler_params=pltpu.CompilerParams(
            dimension_semantics=("parallel",)),
    )(y_nhwc.astype(jnp.float32), shortcut_nhwc.astype(jnp.float32), sc, bi)


# ----------------------------------------------------------------------------
# Glue: fold training-mode BatchNorm (batch stats, biased var) into scale/bias.
# ----------------------------------------------------------------------------
def _pad_vec(v, Cp):
    return jnp.zeros((Cp,), jnp.float32).at[:v.shape[0]].set(
        v.astype(jnp.float32))


def bn_fold_from_x(x_nhwc, gamma, beta, Cp, eps=1e-5):
    mean = jnp.mean(x_nhwc, axis=(0, 1, 2))
    var = jnp.var(x_nhwc, axis=(0, 1, 2))  # biased, as PyTorch uses in fwd
    scale = gamma / jnp.sqrt(var + eps)
    bias = beta - mean * scale
    return _pad_vec(scale, Cp), _pad_vec(bias, Cp)
    # TODO(synk): BatchNorm running-stat updates (training-mode side effect)
    # are not materialized; they do not affect the returned activation.


def bn_fold_from_stats(stats, count, gamma, beta, eps=1e-5):
    """Folding from the per-step [sum, sum_sq] emitted by the conv kernel."""
    Cp = stats.shape[-1]
    s = jnp.sum(stats[:, 0, :], axis=0)
    ss = jnp.sum(stats[:, 1, :], axis=0)
    mean = s / count
    var = jnp.maximum(ss / count - mean * mean, 0.0)  # biased variance
    scale = _pad_vec(gamma, Cp) / jnp.sqrt(var + eps)
    bias = _pad_vec(beta, Cp) - mean * scale
    return scale, bias


def basic_block_forward(x_nchw, params, *, stride=1, nb=1,
                        compute_dtype=jnp.float32):
    """PyramidNet BasicBlock forward (downsample=None). NCHW in / NCHW out."""
    x = jnp.transpose(x_nchw, (0, 2, 3, 1)).astype(jnp.float32)  # -> NHWC
    N, H, W, cin = x.shape
    planes = params["w1"].shape[-1]
    Cpi = _round_up(cin, LANE)
    Cpo = _round_up(planes, LANE)

    # Channel-pad once (zeros); this doubles as the zero-channel-padded
    # shortcut for the residual add (cat(shortcut, zeros)).
    x_p = jnp.pad(x, ((0, 0), (0, 0), (0, 0), (0, Cpi - cin)))

    s1, b1 = bn_fold_from_x(x, params["bn1_gamma"], params["bn1_beta"], Cpi)
    y1, st1 = conv3x3_bn_fused(x_p, params["w1"], s1, b1, stride=stride,
                               relu=False, nb=nb, compute_dtype=compute_dtype)

    Ho, Wo = y1.shape[1], y1.shape[2]
    s2, b2 = bn_fold_from_stats(st1, N * Ho * Wo,
                                params["bn2_gamma"], params["bn2_beta"])
    y2, st2 = conv3x3_bn_fused(y1, params["w2"], s2, b2, stride=1,
                               relu=True, nb=nb, compute_dtype=compute_dtype)

    s3, b3 = bn_fold_from_stats(st2, N * Ho * Wo,
                                params["bn3_gamma"], params["bn3_beta"])

    if Cpi < Cpo:
        shortcut = jnp.pad(x_p, ((0, 0), (0, 0), (0, 0), (0, Cpo - Cpi)))
    else:
        shortcut = x_p[..., :Cpo]
    out_p = bn_add_shortcut(y2, shortcut, s3, b3, nb=nb)

    out = out_p[..., :planes]
    return jnp.transpose(out, (0, 3, 1, 2))  # back to NCHW


# ----------------------------------------------------------------------------
# Pure-JAX reference (for verification)
# ----------------------------------------------------------------------------
def _conv3x3_ref(x, w, stride):
    return jax.lax.conv_general_dilated(
        x, w, window_strides=(stride, stride), padding=((1, 1), (1, 1)),
        dimension_numbers=("NHWC", "HWIO", "NHWC"))


def basic_block_ref(x_nchw, params, *, stride=1):
    x = jnp.transpose(x_nchw, (0, 2, 3, 1)).astype(jnp.float32)

    def bn(v, g, b):
        m = jnp.mean(v, axis=(0, 1, 2))
        var = jnp.var(v, axis=(0, 1, 2))
        return (v - m) / jnp.sqrt(var + 1e-5) * g + b

    o = bn(x, params["bn1_gamma"], params["bn1_beta"])
    o = _conv3x3_ref(o, params["w1"], stride)
    o = bn(o, params["bn2_gamma"], params["bn2_beta"])
    o = jnp.maximum(o, 0.0)
    o = _conv3x3_ref(o, params["w2"], 1)
    o = bn(o, params["bn3_gamma"], params["bn3_beta"])
    csc, cout = x.shape[-1], o.shape[-1]
    shortcut = jnp.pad(x, ((0, 0), (0, 0), (0, 0), (0, cout - csc)))
    o = o + shortcut
    return jnp.transpose(o, (0, 3, 1, 2))


# ----------------------------------------------------------------------------
if __name__ == "__main__":
    N, inplanes, planes, H, W = 2, 4, 8, 16, 16
    stride = 1  # downsample=None path requires stride 1 so residual shapes match

    key = jax.random.PRNGKey(0)
    k1, k2, kx = jax.random.split(key, 3)

    params = {
        # conv weights in HWIO (PyTorch OIHW -> transposed offline)
        "w1": 0.1 * jax.random.normal(k1, (3, 3, inplanes, planes), jnp.float32),
        "w2": 0.1 * jax.random.normal(k2, (3, 3, planes, planes), jnp.float32),
        # nn.BatchNorm2d default init: weight=1, bias=0
        "bn1_gamma": jnp.ones((inplanes,), jnp.float32),
        "bn1_beta": jnp.zeros((inplanes,), jnp.float32),
        "bn2_gamma": jnp.ones((planes,), jnp.float32),
        "bn2_beta": jnp.zeros((planes,), jnp.float32),
        "bn3_gamma": jnp.ones((planes,), jnp.float32),
        "bn3_beta": jnp.zeros((planes,), jnp.float32),
    }

    x = jax.random.normal(kx, (N, inplanes, H, W), jnp.float32)  # NCHW

    out = jax.block_until_ready(basic_block_forward(x, params, stride=stride))
    ref = jax.block_until_ready(basic_block_ref(x, params, stride=stride))

    assert out.shape == (N, planes, H, W), out.shape
    max_err = float(jnp.max(jnp.abs(out - ref)))
    assert jnp.allclose(out, ref, atol=1e-3, rtol=1e-3), max_err

    print("KERNEL_OK")
</pallas_src>

<mosaic_0001>
module attributes {stable_mosaic.version = 11 : i64} {
  func.func @kernel(%arg0: i32, %arg1: memref<1x18x18x128xf32, #tpu.memory_space<vmem>>, %arg2: memref<1152x128xf32, #tpu.memory_space<vmem>>, %arg3: memref<1x128xf32, #tpu.memory_space<vmem>>, %arg4: memref<1x128xf32, #tpu.memory_space<vmem>>, %arg5: memref<1x16x16x128xf32, #tpu.memory_space<vmem>>, %arg6: memref<1x2x128xf32, #tpu.memory_space<vmem>>) attributes {dimension_semantics = [#tpu.dimension_semantics<parallel>], iteration_bounds = array<i64: 2>, scalar_prefetch = 0 : i64, scratch_operands = 0 : i64, tpu.core_type = #tpu.core_type<tc>, window_params = [{transform_indices = @transform_0, window_bounds = array<i64: 1, 18, 18, 128>}, {pipeline_mode = #tpu.pipeline_mode<synchronous>, transform_indices = @transform_1, window_bounds = array<i64: 1152, 128>}, {pipeline_mode = #tpu.pipeline_mode<synchronous>, transform_indices = @transform_2, window_bounds = array<i64: 1, 128>}, {pipeline_mode = #tpu.pipeline_mode<synchronous>, transform_indices = @transform_3, window_bounds = array<i64: 1, 128>}, {transform_indices = @transform_4, window_bounds = array<i64: 1, 16, 16, 128>}, {transform_indices = @transform_5, window_bounds = array<i64: 1, 2, 128>}]} {
    %c0 = arith.constant 0 : index
    %c0_0 = arith.constant 0 : index
    %c0_1 = arith.constant 0 : index
    %c0_2 = arith.constant 0 : index
    %0 = vector.load %arg1[%c0, %c0_0, %c0_1, %c0_2] : memref<1x18x18x128xf32, #tpu.memory_space<vmem>>, vector<1x18x18x128xf32>
    %c0_3 = arith.constant 0 : index
    %c0_4 = arith.constant 0 : index
    %1 = vector.load %arg3[%c0_3, %c0_4] : memref<1x128xf32, #tpu.memory_space<vmem>>, vector<1x128xf32>
    %2 = vector.shape_cast %1 : vector<1x128xf32> to vector<128xf32>
    %3 = vector.shape_cast %2 : vector<128xf32> to vector<1x1x1x128xf32>
    %4 = vector.broadcast %3 : vector<1x1x1x128xf32> to vector<1x18x18x128xf32>
    %5 = arith.mulf %0, %4 : vector<1x18x18x128xf32>
    %c0_5 = arith.constant 0 : index
    %c0_6 = arith.constant 0 : index
    %6 = vector.load %arg4[%c0_5, %c0_6] : memref<1x128xf32, #tpu.memory_space<vmem>>, vector<1x128xf32>
    %7 = vector.shape_cast %6 : vector<1x128xf32> to vector<128xf32>
    %8 = vector.shape_cast %7 : vector<128xf32> to vector<1x1x1x128xf32>
    %9 = vector.broadcast %8 : vector<1x1x1x128xf32> to vector<1x18x18x128xf32>
    %10 = arith.addf %5, %9 : vector<1x18x18x128xf32>
    %11 = tpu.iota {dimensions = array<i32: 1>} : vector<1x18x18x128xi32>
    %12 = tpu.iota {dimensions = array<i32: 2>} : vector<1x18x18x128xi32>
    %c1_i32 = arith.constant 1 : i32
    %13 = vector.broadcast %c1_i32 : i32 to vector<1x18x18x128xi32>
    %14 = arith.cmpi sge, %11, %13 : vector<1x18x18x128xi32>
    %c16_i32 = arith.constant 16 : i32
    %15 = vector.broadcast %c16_i32 : i32 to vector<1x18x18x128xi32>
    %16 = arith.cmpi sle, %11, %15 : vector<1x18x18x128xi32>
    %17 = arith.andi %14, %16 : vector<1x18x18x128xi1>
    %c1_i32_7 = arith.constant 1 : i32
    %18 = vector.broadcast %c1_i32_7 : i32 to vector<1x18x18x128xi32>
    %19 = arith.cmpi sge, %12, %18 : vector<1x18x18x128xi32>
    %20 = arith.andi %17, %19 : vector<1x18x18x128xi1>
    %c16_i32_8 = arith.constant 16 : i32
    %21 = vector.broadcast %c16_i32_8 : i32 to vector<1x18x18x128xi32>
    %22 = arith.cmpi sle, %12, %21 : vector<1x18x18x128xi32>
    %23 = arith.andi %20, %22 : vector<1x18x18x128xi1>
    %cst = arith.constant 0.000000e+00 : f32
    %24 = vector.broadcast %cst : f32 to vector<1x18x18x128xf32>
    %25 = arith.select %23, %10, %24 : vector<1x18x18x128xi1>, vector<1x18x18x128xf32>
    %26 = vector.extract_strided_slice %25 {offsets = [0, 0, 0, 0], sizes = [1, 16, 16, 128], strides = [1, 1, 1, 1]} : vector<1x18x18x128xf32> to vector<1x16x16x128xf32>
    %27 = vector.shape_cast %26 : vector<1x16x16x128xf32> to vector<256x128xf32>
    %28 = vector.extract_strided_slice %25 {offsets = [0, 0, 1, 0], sizes = [1, 16, 16, 128], strides = [1, 1, 1, 1]} : vector<1x18x18x128xf32> to vector<1x16x16x128xf32>
    %29 = vector.shape_cast %28 : vector<1x16x16x128xf32> to vector<256x128xf32>
    %30 = vector.extract_strided_slice %25 {offsets = [0, 0, 2, 0], sizes = [1, 16, 16, 128], strides = [1, 1, 1, 1]} : vector<1x18x18x128xf32> to vector<1x16x16x128xf32>
    %31 = vector.shape_cast %30 : vector<1x16x16x128xf32> to vector<256x128xf32>
    %32 = vector.extract_strided_slice %25 {offsets = [0, 1, 0, 0], sizes = [1, 16, 16, 128], strides = [1, 1, 1, 1]} : vector<1x18x18x128xf32> to vector<1x16x16x128xf32>
    %33 = vector.shape_cast %32 : vector<1x16x16x128xf32> to vector<256x128xf32>
    %34 = vector.extract_strided_slice %25 {offsets = [0, 1, 1, 0], sizes = [1, 16, 16, 128], strides = [1, 1, 1, 1]} : vector<1x18x18x128xf32> to vector<1x16x16x128xf32>
    %35 = vector.shape_cast %34 : vector<1x16x16x128xf32> to vector<256x128xf32>
    %36 = vector.extract_strided_slice %25 {offsets = [0, 1, 2, 0], sizes = [1, 16, 16, 128], strides = [1, 1, 1, 1]} : vector<1x18x18x128xf32> to vector<1x16x16x128xf32>
    %37 = vector.shape_cast %36 : vector<1x16x16x128xf32> to vector<256x128xf32>
    %38 = vector.extract_strided_slice %25 {offsets = [0, 2, 0, 0], sizes = [1, 16, 16, 128], strides = [1, 1, 1, 1]} : vector<1x18x18x128xf32> to vector<1x16x16x128xf32>
    %39 = vector.shape_cast %38 : vector<1x16x16x128xf32> to vector<256x128xf32>
    %40 = vector.extract_strided_slice %25 {offsets = [0, 2, 1, 0], sizes = [1, 16, 16, 128], strides = [1, 1, 1, 1]} : vector<1x18x18x128xf32> to vector<1x16x16x128xf32>
    %41 = vector.shape_cast %40 : vector<1x16x16x128xf32> to vector<256x128xf32>
    %42 = vector.extract_strided_slice %25 {offsets = [0, 2, 2, 0], sizes = [1, 16, 16, 128], strides = [1, 1, 1, 1]} : vector<1x18x18x128xf32> to vector<1x16x16x128xf32>
    %43 = vector.shape_cast %42 : vector<1x16x16x128xf32> to vector<256x128xf32>
    %44 = tpu.concatenate %27, %29, %31, %33, %35, %37, %39, %41, %43 in 1 : vector<256x128xf32>, vector<256x128xf32>, vector<256x128xf32>, vector<256x128xf32>, vector<256x128xf32>, vector<256x128xf32>, vector<256x128xf32>, vector<256x128xf32>, vector<256x128xf32> -> vector<256x1152xf32>
    %c0_9 = arith.constant 0 : index
    %c0_10 = arith.constant 0 : index
    %45 = vector.load %arg2[%c0_9, %c0_10] : memref<1152x128xf32, #tpu.memory_space<vmem>>, vector<1152x128xf32>
    %cst_11 = arith.constant dense<0.000000e+00> : vector<256x128xf32>
    %46 = tpu.matmul %44, %45, %cst_11 {dimension_numbers = #tpu.dot_dimension_numbers<[1], [0], [0], [1], [0, 0, 1, 1], [], []>} : vector<256x1152xf32>, vector<1152x128xf32>, vector<256x128xf32> -> vector<256x128xf32>
    %47 = vector.shape_cast %46 : vector<256x128xf32> to vector<1x16x16x128xf32>
    %c0_12 = arith.constant 0 : index
    %c0_13 = arith.constant 0 : index
    %c0_14 = arith.constant 0 : index
    %c0_15 = arith.constant 0 : index
    %48 = vector.load %arg5[%c0_12, %c0_13, %c0_14, %c0_15] : memref<1x16x16x128xf32, #tpu.memory_space<vmem>>, vector<1x16x16x128xf32>
    tpu.vector_store %arg5[%c0_12, %c0_13, %c0_14, %c0_15], %47 {strides = array<i32>} : memref<1x16x16x128xf32, #tpu.memory_space<vmem>>, vector<1x16x16x128xf32>,
    %cst_16 = arith.constant dense<0.000000e+00> : vector<128xf32>
    %49 = vector.multi_reduction <add>, %46, %cst_16 [0] : vector<256x128xf32> to vector<128xf32>
    %50 = vector.shape_cast %49 : vector<128xf32> to vector<1x128xf32>
    %51 = arith.mulf %46, %46 : vector<256x128xf32>
    %cst_17 = arith.constant dense<0.000000e+00> : vector<128xf32>
    %52 = vector.multi_reduction <add>, %51, %cst_17 [0] : vector<256x128xf32> to vector<128xf32>
    %53 = vector.shape_cast %52 : vector<128xf32> to vector<1x128xf32>
    %54 = tpu.concatenate %50, %53 in 0 : vector<1x128xf32>, vector<1x128xf32> -> vector<2x128xf32>
    %c0_18 = arith.constant 0 : index
    %c0_19 = arith.constant 0 : index
    %c0_20 = arith.constant 0 : index
    %55 = vector.load %arg6[%c0_18, %c0_19, %c0_20] : memref<1x2x128xf32, #tpu.memory_space<vmem>>, vector<1x2x128xf32>
    %56 = vector.shape_cast %55 : vector<1x2x128xf32> to vector<2x128xf32>
    %57 = vector.shape_cast %54 : vector<2x128xf32> to vector<1x2x128xf32>
    tpu.vector_store %arg6[%c0_18, %c0_19, %c0_20], %57 {strides = array<i32>} : memref<1x2x128xf32, #tpu.memory_space<vmem>>, vector<1x2x128xf32>,
    return
  }
  func.func @transform_0(%arg0: i32) -> (i32, i32, i32, i32) {
    %c0_i32 = arith.constant 0 : i32
    %c0_i32_0 = arith.constant 0 : i32
    %c0_i32_1 = arith.constant 0 : i32
    %c0_i32_2 = arith.constant 0 : i32
    return %arg0, %c0_i32, %c0_i32_0, %c0_i32_1 : i32, i32, i32, i32
  }
  func.func @transform_1(%arg0: i32) -> (i32, i32) {
    %c0_i32 = arith.constant 0 : i32
    %c0_i32_0 = arith.constant 0 : i32
    %c0_i32_1 = arith.constant 0 : i32
    return %c0_i32, %c0_i32_0 : i32, i32
  }
  func.func @transform_2(%arg0: i32) -> (i32, i32) {
    %c0_i32 = arith.constant 0 : i32
    %c0_i32_0 = arith.constant 0 : i32
    %c0_i32_1 = arith.constant 0 : i32
    return %c0_i32, %c0_i32_0 : i32, i32
  }
  func.func @transform_3(%arg0: i32) -> (i32, i32) {
    %c0_i32 = arith.constant 0 : i32
    %c0_i32_0 = arith.constant 0 : i32
    %c0_i32_1 = arith.constant 0 : i32
    return %c0_i32, %c0_i32_0 : i32, i32
  }
  func.func @transform_4(%arg0: i32) -> (i32, i32, i32, i32) {
    %c0_i32 = arith.constant 0 : i32
    %c0_i32_0 = arith.constant 0 : i32
    %c0_i32_1 = arith.constant 0 : i32
    %c0_i32_2 = arith.constant 0 : i32
    return %arg0, %c0_i32, %c0_i32_0, %c0_i32_1 : i32, i32, i32, i32
  }
  func.func @transform_5(%arg0: i32) -> (i32, i32, i32) {
    %c0_i32 = arith.constant 0 : i32
    %c0_i32_0 = arith.constant 0 : i32
    %c0_i32_1 = arith.constant 0 : i32
    return %arg0, %c0_i32, %c0_i32_0 : i32, i32, i32
  }
}

</mosaic_0001>

<bundles_post_ra>
// kernel: tpu_custom_call.1
= control target key start
LH: loop header
LB: loop body
LE: loop exit
PB: predicated region body
PF: predicated region fallthrough
CT: control target
= control target key end

     0   :  { %11 = vsyncpa [#allocation3], 0  ;;  %s5172_s0 = inlined_call_operand.vmem [shape: f32[2,18,18,128], index: 0, kind: input, shape index: {}]   ;;  %s5173_s1 = inlined_call_operand.vmem [shape: f32[1152,128], index: 1, kind: input, shape index: {}]   ;;  %s5174_s2 = inlined_call_operand.vmem [shape: f32[1,128], index: 2, kind: input, shape index: {}]   ;;  %s5175_s3 = inlined_call_operand.vmem [shape: f32[1,128], index: 3, kind: input, shape index: {}]   ;;  %s5176_s4 = inlined_call_operand.hbm [shape: f32[2,16,16,128], index: 4, kind: output, shape index: {0}]   ;;  %s5177_s5 = inlined_call_operand.hbm [shape: f32[2,2,128], index: 5, kind: output, shape index: {1}]  }
   0x1   :  { %13 = vsyncpa [#allocation3 + $0x1], 0 }
   0x2   :  { %14 = vsyncpa [#allocation5], 0 }
   0x3   :  { %16 = vsyncpa [#allocation5 + $0x1], 0  ;;  %s3096_s18 = smov 0   ;;  %s3098_s19 = smov 0  }
   0x4   :  { %s3100_s20 = smov 0   ;;  %s3102_s21 = smov 0  }
   0x5 LB: > { %s3117_s22 = sadd.s32 4294967295, %s3058_s21   ;;  %s2330_s23 = sadd.s32 4294967294, %s3058_s21   ;;  %s3058_s21 = sphi %s3102_s21, %s5394_s21   ;;  %s3054_s20 = sphi %s3100_s20, %s5393_s20   ;;  %s3050_s19 = sphi %s3098_s19, %s5392_s19   ;;  %s3046_s18 = sphi %s3096_s18, %s5391_s18  }
   0x6   : > { %s3121_s24 = sadd.s32 1, %s3058_s21   ;;  %s118_s25 = sadd.s32 1, %s3054_s20 }
   0x7   : > { %s115_s26 = ssub.s32 %s3058_s21, %s3121_s24  ;;  %p128_p0 = scmp.ne.s32.totalorder %s3054_s20, %s3050_s19 }
   0x8   : > { %p116_p1 = scmp.eq.s32.totalorder %s115_s26, 0  ;;  %p129_p2 = scmp.eq.s32.totalorder %s3117_s22, 1 }
   0x9   : > { %p134_p3 = scmp.ne.s32.totalorder %s3050_s19, %s3046_s18  ;;  %p135_p4 = scmp.eq.s32.totalorder %s2330_s23, 1 }
   0xa   : > { %s3132_s27 = scalar_select %p116_p1, %s3054_s20, %s118_s25  }
   0xb   : > { %p3134_p5 = por %p129_p2, %p128_p0  ;;  %p3138_p6 = por %p135_p4, %p134_p3 }
   0xc   : > { %p2333_p7 = scmp.ge.s32.totalorder %s3058_s21, 1  ;;  %p196_p8 = scmp.lt.s32.totalorder %s3058_s21, 3 }
   0xe   : > { %p197_p9 = pnand %p2333_p7, %p196_p8 }
  0x10   : > { %200 = sbr.rel (%p197_p9) target bundleno = 680 (0x2a8), region = 36 }
  0x17   : > { %v794_v0 = vld [vmem:[%s5173_s1] sm:$0xff]  ;;  %v795_v1 = vld [vmem:[%s5173_s1 + $0x8] sm:$0xff]  ;;  %v5180_v3 = vmov 0.0|0.0   ;;  %v796_v6 = vld [vmem:[%s5173_s1 + $0x10] sm:$0xff]  ;;  %v5178_v8 = vmov 0.0   ;;  %p229_p10 = scmp.lt.s32.totalorder %s3117_s22, 1  ;;  %v410_v32 = vlaneseq }
  0x18   : > { %v826_v2 = vld [vmem:[%s5173_s1 + $0x100] sm:$0xff]  ;;  %2521 = vmatprep.subr.bf16.mxu1 %v5180_v3  ;;  %2569 = vmatprep.subr.bf16.mxu0 %v5180_v3  ;;  %v2522_v4 = vpack.c.bf16 %v795_v1, %v794_v0  ;;  %v827_v5 = vld [vmem:[%s5173_s1 + $0x108] sm:$0xff]  ;;  %v797_v7 = vld [vmem:[%s5173_s1 + $0x18] sm:$0xff]  ;;  %v3165_v9 = vrot.slane %v5178_v8, 1  ;;  %vm534_vm2 = vcmask 1046528   ;;  %vm647_vm3 = vcmask 1045504  }
  0x19   : > { %v2570_v10 = vpack.c.bf16 %v827_v5, %v826_v2  ;;  %v828_v11 = vld [vmem:[%s5173_s1 + $0x110] sm:$0xff]  ;;  %v829_v12 = vld [vmem:[%s5173_s1 + $0x118] sm:$0xff]  ;;  %v2525_v13 = vpack.c.bf16 %v797_v7, %v796_v6  ;;  %v798_v15 = vld [vmem:[%s5173_s1 + $0x20] sm:$0xff]  ;;  %s230_s30 = scalar_select %p229_p10, %s3117_s22, 1  ;;  %v3237_v39 = vshrl.u32 %v410_v32, 7 }
  0x1a   : > { %5273 = vst [vmem:[#allocation8_spill] sm:$0xff] %v3165_v9  ;;  %2523 = vmatpush1.bf16.msra.mxu1 %v2522_v4  ;;  %1002 = vmatprep.mubr.f32.mxu1 %v3165_v9  ;;  %v2573_v14 = vpack.c.bf16 %v829_v12, %v828_v11  ;;  %v799_v16 = vld [vmem:[%s5173_s1 + $0x28] sm:$0xff]  ;;  %v830_v17 = vld [vmem:[%s5173_s1 + $0x120] sm:$0xff]  ;;  %v800_v21 = vld [vmem:[%s5173_s1 + $0x30] sm:$0xff]  ;;  %s2392_s26 = sshll.u32 %s3117_s22, 12  ;;  %s3062_s12 = smov [#allocation2]  }
  0x1b   : > { %2571 = vmatpush1.bf16.msra.mxu0 %v2570_v10  ;;  %2524 = vmatprep.subr.bf16.mxu1 %v5180_v3  ;;  %v831_v18 = vld [vmem:[%s5173_s1 + $0x128] sm:$0xff]  ;;  %v2528_v19 = vpack.c.bf16 %v799_v16, %v798_v15  ;;  %v801_v22 = vld [vmem:[%s5173_s1 + $0x38] sm:$0xff]  ;;  %v832_v23 = vld [vmem:[%s5173_s1 + $0x130] sm:$0xff]  ;;  %s2913_s14 = smul.u32 432, %s230_s30  ;;  %vm414_vm0 = vcmp.ge.s32.totalorder %v3237_v39, 1  ;;  %s5020_s8 = scalar_lea.hbm %s5176_s4, %s2392_s26 }
  0x1c   : > { %2572 = vmatprep.subr.bf16.mxu0 %v5180_v3  ;;  %v2576_v20 = vpack.c.bf16 %v831_v18, %v830_v17  ;;  %v833_v24 = vld [vmem:[%s5173_s1 + $0x138] sm:$0xff]  ;;  %v2531_v25 = vpack.c.bf16 %v801_v22, %v800_v21  ;;  %v802_v27 = vld [vmem:[%s5173_s1 + $0x40] sm:$0xff]  ;;  %v803_v28 = vld [vmem:[%s5173_s1 + $0x48] sm:$0xff]  ;;  %s2968_s13 = sshll.u32 %s3062_s12, 4  ;;  %s2969_s13 = int_to_ptr.vmem [resolvable:$false] %s2968_s13 }
  0x1d   : > { %v2579_v26 = vpack.c.bf16 %v833_v24, %v832_v23  ;;  %v834_v29 = vld [vmem:[%s5173_s1 + $0x140] sm:$0xff]  ;;  %v835_v30 = vld [vmem:[%s5173_s1 + $0x148] sm:$0xff]  ;;  %v2534_v31 = vpack.c.bf16 %v803_v28, %v802_v27  ;;  %v804_v34 = vld [vmem:[%s5173_s1 + $0x50] sm:$0xff]  ;;  %s3235_s9 = scalar_lea.vmem %s5172_s0, %s2913_s14  ;;  %s2970_s15 = scalar_lea.vmem %s2969_s13, 8192 }
  0x1e   : > { %2526 = vmatpush1.bf16.msra.mxu1 %v2525_v13  ;;  %v2582_v33 = vpack.c.bf16 %v835_v30, %v834_v29  ;;  %v805_v35 = vld [vmem:[%s5173_s1 + $0x58] sm:$0xff]  ;;  %v836_v36 = vld [vmem:[%s5173_s1 + $0x150] sm:$0xff]  ;;  %v806_v41 = vld [vmem:[%s5173_s1 + $0x60] sm:$0xff] }
  0x1f   : > { %2574 = vmatpush1.bf16.msra.mxu0 %v2573_v14  ;;  %2527 = vmatprep.subr.bf16.mxu1 %v5180_v3  ;;  %v837_v37 = vld [vmem:[%s5173_s1 + $0x158] sm:$0xff]  ;;  %v2537_v38 = vpack.c.bf16 %v805_v35, %v804_v34  ;;  %v807_v42 = vld [vmem:[%s5173_s1 + $0x68] sm:$0xff]  ;;  %v838_v43 = vld [vmem:[%s5173_s1 + $0x160] sm:$0xff] }
  0x20   : > { %2575 = vmatprep.subr.bf16.mxu0 %v5180_v3  ;;  %v2585_v40 = vpack.c.bf16 %v837_v37, %v836_v36  ;;  %v839_v44 = vld [vmem:[%s5173_s1 + $0x168] sm:$0xff]  ;;  %v237_v45 = vld [vmem:[%s3235_s9 + $0x18] sm:$0xff]  ;;  %v3257_v46 = vld [vmem:[%s5174_s2] ss:$0 sm:$0xff]  ;;  %v2540_v49 = vpack.c.bf16 %v807_v42, %v806_v41 }
  0x21   : > { %v298_v47 = vmul.f32 %v3257_v46, %v237_v45  ;;  %v3263_v48 = vld [vmem:[%s5175_s3] ss:$0 sm:$0xff]  ;;  %v2588_v50 = vpack.c.bf16 %v839_v44, %v838_v43  ;;  %v808_v51 = vld [vmem:[%s5173_s1 + $0x70] sm:$0xff]  ;;  %v809_v52 = vld [vmem:[%s5173_s1 + $0x78] sm:$0xff] }
  0x22   : > { %2529 = vmatpush1.bf16.msra.mxu1 %v2528_v19  ;;  %v840_v54 = vld [vmem:[%s5173_s1 + $0x170] sm:$0xff]  ;;  %v841_v55 = vld [vmem:[%s5173_s1 + $0x178] sm:$0xff]  ;;  %v2543_v56 = vpack.c.bf16 %v809_v52, %v808_v51  ;;  %v810_v58 = vld [vmem:[%s5173_s1 + $0x80] sm:$0xff] }
  0x23   : > { %2577 = vmatpush1.bf16.msra.mxu0 %v2576_v20  ;;  %2530 = vmatprep.subr.bf16.mxu1 %v5180_v3  ;;  %v3274_v53 = vadd.f32 %v3263_v48, %v298_v47  ;;  %v2591_v57 = vpack.c.bf16 %v841_v55, %v840_v54  ;;  %v811_v59 = vld [vmem:[%s5173_s1 + $0x88] sm:$0xff]  ;;  %v842_v60 = vld [vmem:[%s5173_s1 + $0x180] sm:$0xff]  ;;  %v812_v0 = vld [vmem:[%s5173_s1 + $0x90] sm:$0xff] }
  0x24   : > { %2578 = vmatprep.subr.bf16.mxu0 %v5180_v3  ;;  %v843_v61 = vld [vmem:[%s5173_s1 + $0x188] sm:$0xff]  ;;  %v2546_v62 = vpack.c.bf16 %v811_v59, %v810_v58  ;;  %v813_v1 = vld [vmem:[%s5173_s1 + $0x98] sm:$0xff]  ;;  %v844_v2 = vld [vmem:[%s5173_s1 + $0x190] sm:$0xff] }
  0x25   : > { %2354 = vmatprep.mubr.msk.f32.mxu0 %vm414_vm0, %v3274_v53  ;;  %v2594_v63 = vpack.c.bf16 %v843_v61, %v842_v60  ;;  %v845_v4 = vld [vmem:[%s5173_s1 + $0x198] sm:$0xff]  ;;  %v2549_v5 = vpack.c.bf16 %v813_v1, %v812_v0  ;;  %v814_v7 = vld [vmem:[%s5173_s1 + $0xa0] sm:$0xff]  ;;  %v815_v10 = vld [vmem:[%s5173_s1 + $0xa8] sm:$0xff]  ;;  %v435_v59 = vsel %vm414_vm0, %v3274_v53, 0.0  ;;  %v3432_v1 = vrot.slane %v5178_v8, 2 }
  0x26   : > { %2532 = vmatpush1.bf16.msra.mxu1 %v2531_v25  ;;  %v2597_v6 = vpack.c.bf16 %v845_v4, %v844_v2  ;;  %v846_v11 = vld [vmem:[%s5173_s1 + $0x1a0] sm:$0xff]  ;;  %v847_v12 = vld [vmem:[%s5173_s1 + $0x1a8] sm:$0xff]  ;;  %v2552_v13 = vpack.c.bf16 %v815_v10, %v814_v7  ;;  %v816_v15 = vld [vmem:[%s5173_s1 + $0xb0] sm:$0xff] }
  0x27   : > { %2580 = vmatpush1.bf16.msra.mxu0 %v2579_v26  ;;  %2533 = vmatprep.subr.bf16.mxu1 %v5180_v3  ;;  %v2600_v14 = vpack.c.bf16 %v847_v12, %v846_v11  ;;  %v817_v16 = vld [vmem:[%s5173_s1 + $0xb8] sm:$0xff]  ;;  %v848_v17 = vld [vmem:[%s5173_s1 + $0x1b0] sm:$0xff]  ;;  %v818_v21 = vld [vmem:[%s5173_s1 + $0xc0] sm:$0xff]  ;;  %5275 = vst [vmem:[#allocation10_spill] sm:$0xff] %v3432_v1 }
  0x28   : > { %2581 = vmatprep.subr.bf16.mxu0 %v5180_v3  ;;  %v849_v18 = vld [vmem:[%s5173_s1 + $0x1b8] sm:$0xff]  ;;  %v2555_v19 = vpack.c.bf16 %v817_v16, %v816_v15  ;;  %v819_v22 = vld [vmem:[%s5173_s1 + $0xc8] sm:$0xff]  ;;  %v850_v23 = vld [vmem:[%s5173_s1 + $0x1c0] sm:$0xff] }
  0x29   : > { %v2603_v20 = vpack.c.bf16 %v849_v18, %v848_v17  ;;  %v851_v24 = vld [vmem:[%s5173_s1 + $0x1c8] sm:$0xff]  ;;  %v2558_v25 = vpack.c.bf16 %v819_v22, %v818_v21  ;;  %v820_v27 = vld [vmem:[%s5173_s1 + $0xd0] sm:$0xff]  ;;  %v821_v28 = vld [vmem:[%s5173_s1 + $0xd8] sm:$0xff]  ;;  %v653_v17 = vrot.slane %v435_v59, 2 }
  0x2a   : > { %2535 = vmatpush1.bf16.msra.mxu1 %v2534_v31  ;;  %v2606_v26 = vpack.c.bf16 %v851_v24, %v850_v23  ;;  %v852_v29 = vld [vmem:[%s5173_s1 + $0x1d0] sm:$0xff]  ;;  %v853_v30 = vld [vmem:[%s5173_s1 + $0x1d8] sm:$0xff]  ;;  %v2561_v31 = vpack.c.bf16 %v821_v28, %v820_v27  ;;  %v823_v34 = vld [vmem:[%s5173_s1 + $0xe8] sm:$0xff] }
  0x2b   : > { %2583 = vmatpush1.bf16.msra.mxu0 %v2582_v33  ;;  %2536 = vmatprep.subr.bf16.mxu1 %v5180_v3  ;;  %v2609_v32 = vpack.c.bf16 %v853_v30, %v852_v29  ;;  %v822_v33 = vld [vmem:[%s5173_s1 + $0xe0] sm:$0xff]  ;;  %v855_v36 = vld [vmem:[%s5173_s1 + $0x1e8] sm:$0xff]  ;;  %v824_v42 = vld [vmem:[%s5173_s1 + $0xf0] sm:$0xff] }
  0x2c   : > { %2584 = vmatprep.subr.bf16.mxu0 %v5180_v3  ;;  %v854_v35 = vld [vmem:[%s5173_s1 + $0x1e0] sm:$0xff]  ;;  %v825_v43 = vld [vmem:[%s5173_s1 + $0xf8] sm:$0xff]  ;;  %v856_v45 = vld [vmem:[%s5173_s1 + $0x1f0] sm:$0xff] }
  0x2d   : > { %v238_v37 = vld [vmem:[%s3235_s9 + $0x20] sm:$0xff]  ;;  %v2612_v41 = vpack.c.bf16 %v855_v36, %v854_v35  ;;  %v857_v47 = vld [vmem:[%s5173_s1 + $0x1f8] sm:$0xff]  ;;  %v2567_v51 = vpack.c.bf16 %v825_v43, %v824_v42  ;;  %v240_v52 = vld [vmem:[%s3235_s9 + $0x30] sm:$0xff] }
  0x2e   : > { %2538 = vmatpush1.bf16.msra.mxu1 %v2537_v38  ;;  %v239_v38 = vld [vmem:[%s3235_s9 + $0x28] sm:$0x3]  ;;  %v299_v44 = vmul.f32 %v3257_v46, %v238_v37  ;;  %v2615_v54 = vpack.c.bf16 %v857_v47, %v856_v45  ;;  %v301_v61 = vmul.f32 %v3257_v46, %v240_v52  ;;  %v860_v7 = vld [vmem:[%s5173_s1 + $0x210] sm:$0xff]  ;;  %v861_v10 = vld [vmem:[%s5173_s1 + $0x218] sm:$0xff] }
  0x2f   : > { %2586 = vmatpush1.bf16.msra.mxu0 %v2585_v40  ;;  %2539 = vmatprep.subr.bf16.mxu1 %v5180_v3  ;;  %v2564_v40 = vpack.c.bf16 %v823_v34, %v822_v33  ;;  %v859_v58 = vld [vmem:[%s5173_s1 + $0x208] sm:$0xff]  ;;  %v892_v15 = vld [vmem:[%s5173_s1 + $0x310] sm:$0xff]  ;;  %v893_v16 = vld [vmem:[%s5173_s1 + $0x318] sm:$0xff]  ;;  %v2621_v22 = vpack.c.bf16 %v861_v10, %v860_v7 }
  0x30   : > { %2587 = vmatprep.subr.bf16.mxu0 %v5180_v3  ;;  %v3408_v55 = vadd.f32 %v3263_v48, %v299_v44  ;;  %v891_v0 = vld [vmem:[%s5173_s1 + $0x308] sm:$0xff]  ;;  %v244_v28 = vld [vmem:[%s3235_s9 + $0x50] sm:$0xff]  ;;  %v3485_v29 = vpack.c.bf16 %v893_v16, %v892_v15  ;;  %v865_v44 = vld [vmem:[%s5173_s1 + $0x238] sm:$0xff] }
  0x31   : > { %v895_v33 = vld [vmem:[%s5173_s1 + $0x328] sm:$0xff]  ;;  %v864_v43 = vld [vmem:[%s5173_s1 + $0x230] sm:$0xff]  ;;  %v898_v10 = vld [vmem:[%s5173_s1 + $0x340] sm:$0xff] }
  0x32   : > { %2541 = vmatpush1.bf16.msra.mxu1 %v2540_v49  ;;  %v300_v49 = vmul.f32 %v3257_v46, %v239_v38  ;;  %v654_v18 = vrot.slane %v3408_v55, 2  ;;  %v896_v52 = vld [vmem:[%s5173_s1 + $0x330] sm:$0xff] }
  0x33   : > { %2589 = vmatpush1.bf16.msra.mxu0 %v2588_v50  ;;  %2542 = vmatprep.subr.bf16.mxu1 %v5180_v3  ;;  %v3403_v50 = vadd.s32 16, %v3237_v39  ;;  %v248_v7 = vld [vmem:[%s3235_s9 + $0x70] sm:$0x3] }
  0x34   : > { %2590 = vmatprep.subr.bf16.mxu0 %v5180_v3  ;;  %v361_v60 = vadd.f32 %v3263_v48, %v300_v49  ;;  %v3500_v34 = vsel %vm647_vm3, %v653_v17, %v654_v18 }
  0x35   : > { %5274 = vst [vmem:[#allocation9_spill] sm:$0xff] %v3403_v50  ;;  %vm425_vm1 = vcmp.le.s32.totalorder %v3403_v50, 16 }
  0x36   : > { %2544 = vmatpush1.bf16.msra.mxu1 %v2543_v56  ;;  %v241_v56 = vld [vmem:[%s3235_s9 + $0x38] sm:$0xff]  ;;  %v437_v11 = vsel %vm425_vm1, %v361_v60, 0.0 }
  0x37   : > { %2592 = vmatpush1.bf16.msra.mxu0 %v2591_v57  ;;  %2545 = vmatprep.subr.bf16.mxu1 %v5180_v3  ;;  %v858_v57 = vld [vmem:[%s5173_s1 + $0x200] sm:$0xff]  ;;  %v302_v2 = vmul.f32 %v3257_v46, %v241_v56  ;;  %v543_v23 = vrot.slane %v437_v11, 1  ;;  %v656_v35 = vrot.slane %v437_v11, 2  ;;  %v899_v11 = vld [vmem:[%s5173_s1 + $0x348] sm:$0xff] }
  0x38   : > { %2593 = vmatprep.subr.bf16.mxu0 %v5180_v3  ;;  %v2618_v4 = vpack.c.bf16 %v859_v58, %v858_v57 }
  0x3a   : > { %2547 = vmatpush1.bf16.msra.mxu1 %v2546_v62  ;;  %v242_v62 = vld [vmem:[%s3235_s9 + $0x40] sm:$0x3] }
  0x3b   : > { %2595 = vmatpush1.bf16.msra.mxu0 %v2594_v63  ;;  %2548 = vmatprep.subr.bf16.mxu1 %v5180_v3  ;;  %v890_v63 = vld [vmem:[%s5173_s1 + $0x300] sm:$0xff]  ;;  %v303_v12 = vmul.f32 %v3257_v46, %v242_v62  ;;  %v2627_v62 = vpack.c.bf16 %v865_v44, %v864_v43 }
  0x3c   : > { %2596 = vmatprep.subr.bf16.mxu0 %v5180_v3 }
  0x3d   : > { %v364_v27 = vadd.f32 %v3263_v48, %v303_v12 }
  0x3e   : > { %2550 = vmatpush1.bf16.msra.mxu1 %v2549_v5  ;;  %v540_v5 = vrot.slane %v435_v59, 1 }
  0x3f   : > { %2598 = vmatpush1.bf16.msra.mxu0 %v2597_v6  ;;  %2551 = vmatprep.subr.bf16.mxu1 %v5180_v3  ;;  %v541_v6 = vrot.slane %v3408_v55, 1  ;;  %v3514_v42 = vsel %vm425_vm1, %v364_v27, 0.0  ;;  %v3613_v27 = vpack.c.bf16 %v899_v11, %v898_v10  ;;  %v872_v11 = vld [vmem:[%s5173_s1 + $0x270] sm:$0xff] }
  0x40   : > { %2599 = vmatprep.subr.bf16.mxu0 %v5180_v3  ;;  %v548_v59 = vrot.slane %v3514_v42, 1  ;;  %v661_v17 = vrot.slane %v3514_v42, 2  ;;  %v250_v42 = vld [vmem:[%s3235_s9 + $0x80] sm:$0xff] }
  0x41   : > { %v3468_v21 = vsel %vm534_vm2, %v540_v5, %v541_v6  ;;  %v3508_v38 = vsel %vm534_vm2, %v541_v6, %v543_v23  ;;  %v867_v5 = vld [vmem:[%s5173_s1 + $0x248] sm:$0xff] }
  0x42   : > { %2553 = vmatpush1.bf16.msra.mxu1 %v2552_v13  ;;  %v3447_v13 = vpack.c.bf16 %v891_v0, %v890_v63  ;;  %v247_v63 = vld [vmem:[%s3235_s9 + $0x68] sm:$0xff] }
  0x43   : > { %2601 = vmatpush1.bf16.msra.mxu0 %v2600_v14  ;;  %2554 = vmatprep.subr.bf16.mxu1 %v5180_v3  ;;  %v3451_v14 = vadd.f32 %v3263_v48, %v301_v61  ;;  %v308_v15 = vmul.f32 %v3257_v46, %v247_v63  ;;  %v311_v63 = vmul.f32 %v3257_v46, %v250_v42 }
  0x44   : > { %2602 = vmatprep.subr.bf16.mxu0 %v5180_v3 }
  0x45   : > { %5276 = vst [vmem:[#allocation11_spill] sm:$0xff] %v3451_v14  ;;  %v3473_v24 = vsel %vm414_vm0, %v3451_v14, 0.0 }
  0x46   : > { %2556 = vmatpush1.bf16.msra.mxu1 %v2555_v19  ;;  %v3463_v19 = vadd.f32 %v3263_v48, %v302_v2  ;;  %v545_v36 = vrot.slane %v3473_v24, 1  ;;  %v658_v57 = vrot.slane %v3473_v24, 2  ;;  %v309_v24 = vmul.f32 %v3257_v46, %v248_v7 }
  0x47   : > { %2604 = vmatpush1.bf16.msra.mxu0 %v2603_v20  ;;  %2557 = vmatprep.subr.bf16.mxu1 %v5180_v3  ;;  %v243_v20 = vld [vmem:[%s3235_s9 + $0x48] sm:$0xff] }
  0x48   : > { %2605 = vmatprep.subr.bf16.mxu0 %v5180_v3  ;;  %5277 = vst [vmem:[#allocation12_spill] sm:$0xff] %v3463_v19  ;;  %v304_v30 = vmul.f32 %v3257_v46, %v243_v20  ;;  %v546_v37 = vrot.slane %v3463_v19, 1  ;;  %v659_v58 = vrot.slane %v3463_v19, 2  ;;  %v370_v44 = vadd.f32 %v3263_v48, %v309_v24 }
  0x4a   : > { %2559 = vmatpush1.bf16.msra.mxu1 %v2558_v25  ;;  %v862_v25 = vld [vmem:[%s5173_s1 + $0x220] sm:$0xff]  ;;  %v3530_v49 = vadd.f32 %v3263_v48, %v304_v30  ;;  %v3546_v56 = vsel %vm534_vm2, %v545_v36, %v546_v37  ;;  %v3585_v12 = vsel %vm647_vm3, %v658_v57, %v659_v58  ;;  %v3593_v16 = vsel %vm534_vm2, %v546_v37, %v548_v59  ;;  %v901_v30 = vld [vmem:[%s5173_s1 + $0x358] sm:$0xff]  ;;  %v251_v57 = vld [vmem:[%s3235_s9 + $0x88] sm:$0x3] }
  0x4b   : > { %2607 = vmatpush1.bf16.msra.mxu0 %v2606_v26  ;;  %2560 = vmatprep.subr.bf16.mxu1 %v5180_v3  ;;  %v863_v26 = vld [vmem:[%s5173_s1 + $0x228] sm:$0xff]  ;;  %v249_v36 = vld [vmem:[%s3235_s9 + $0x78] sm:$0xff]  ;;  %v3640_v37 = vsel %vm647_vm3, %v659_v58, %v661_v17  ;;  %v902_v58 = vld [vmem:[%s5173_s1 + $0x360] sm:$0xff]  ;;  %v3685_v7 = vsel %vm425_vm1, %v370_v44, 0.0  ;;  %v312_v10 = vmul.f32 %v3257_v46, %v251_v57 }
  0x4c   : > { %2608 = vmatprep.subr.bf16.mxu0 %v5180_v3  ;;  %5278 = vst [vmem:[#allocation13_spill] sm:$0xff] %v3530_v49  ;;  %v3558_v61 = vsel %vm414_vm0, %v3530_v49, 0.0  ;;  %v903_v59 = vld [vmem:[%s5173_s1 + $0x368] sm:$0xff] }
  0x4d   : > { %v373_v42 = vadd.f32 %v3263_v48, %v312_v10  ;;  %v907_v57 = vld [vmem:[%s5173_s1 + $0x388] sm:$0xff] }
  0x4e   : > { %2562 = vmatpush1.bf16.msra.mxu1 %v2561_v31  ;;  %v245_v31 = vld [vmem:[%s3235_s9 + $0x58] sm:$0x3] }
  0x4f   : > { %2610 = vmatpush1.bf16.msra.mxu0 %v2609_v32  ;;  %2563 = vmatprep.subr.bf16.mxu1 %v5180_v3  ;;  %v894_v32 = vld [vmem:[%s5173_s1 + $0x320] sm:$0xff]  ;;  %v306_v45 = vmul.f32 %v3257_v46, %v245_v31  ;;  %v663_v31 = vrot.slane %v3558_v61, 2 }
  0x50   : > { %2611 = vmatprep.subr.bf16.mxu0 %v5180_v3  ;;  %v3524_v47 = vpack.c.bf16 %v895_v33, %v894_v32  ;;  %v3630_v33 = vadd.f32 %v3263_v48, %v308_v15  ;;  %v3696_v15 = vpack.c.bf16 %v903_v59, %v902_v58 }
  0x51   : > { %v367_v2 = vadd.f32 %v3263_v48, %v306_v45  ;;  %v870_v45 = vld [vmem:[%s5173_s1 + $0x260] sm:$0xff] }
  0x52   : > { %2565 = vmatpush1.bf16.msra.mxu1 %v2564_v40  ;;  %v2624_v40 = vpack.c.bf16 %v863_v26, %v862_v25  ;;  %v868_v25 = vld [vmem:[%s5173_s1 + $0x250] sm:$0xff]  ;;  %v869_v26 = vld [vmem:[%s5173_s1 + $0x258] sm:$0xff]  ;;  %5281 = vst [vmem:[#allocation16_spill] sm:$0xff] %v3630_v33  ;;  %5282 = vst [vmem:[#allocation17_spill] sm:$0xff] %v3696_v15 }
  0x53   : > { %2613 = vmatpush1.bf16.msra.mxu0 %v2612_v41  ;;  %2566 = vmatprep.subr.bf16.mxu1 %v5180_v3  ;;  %v305_v41 = vmul.f32 %v3257_v46, %v244_v28  ;;  %v3602_v23 = vsel %vm425_vm1, %v367_v2, 0.0  ;;  %v900_v28 = vld [vmem:[%s5173_s1 + $0x350] sm:$0xff]  ;;  %v2633_v43 = vpack.c.bf16 %v869_v26, %v868_v25  ;;  %v669_v25 = vrot.slane %v3630_v33, 2 }
  0x54   : > { %2614 = vmatprep.subr.bf16.mxu0 %v5180_v3  ;;  %v3719_v26 = vadd.f32 %v3263_v48, %v311_v63 }
  0x55   : > { %v3553_v60 = vadd.f32 %v3263_v48, %v305_v41  ;;  %v553_v41 = vrot.slane %v3602_v23, 1 }
  0x56   : > { %2568 = vmatpush1.bf16.msra.mxu1 %v2567_v51  ;;  %v246_v51 = vld [vmem:[%s3235_s9 + $0x60] sm:$0xff]  ;;  %5284 = vst [vmem:[#allocation19_spill] sm:$0xff] %v3719_v26  ;;  %v561_v59 = vrot.slane %v3719_v26, 1 }
  0x57   : > { %2616 = vmatpush1.bf16.msra.mxu0 %v2615_v54  ;;  %2745 = vmatprep.subr.bf16.mxu1 %v5180_v3  ;;  %v897_v54 = vld [vmem:[%s5173_s1 + $0x338] sm:$0xff]  ;;  %5279 = vst [vmem:[#allocation14_spill] sm:$0xff] %v3553_v60  ;;  %v307_v0 = vmul.f32 %v3257_v46, %v246_v51  ;;  %v664_v32 = vrot.slane %v3553_v60, 2  ;;  %v871_v51 = vld [vmem:[%s5173_s1 + $0x268] sm:$0xff] }
  0x58   : > { %2617 = vmatprep.subr.bf16.mxu0 %v5180_v3  ;;  %v3571_v6 = vpack.c.bf16 %v897_v54, %v896_v52  ;;  %v3656_v52 = vpack.c.bf16 %v901_v30, %v900_v28  ;;  %v310_v54 = vmul.f32 %v3257_v46, %v249_v36  ;;  %v252_v28 = vld [vmem:[%s3235_s9 + $0x90] sm:$0xff] }
  0x59   : > { %1003 = vmatmul.mubr.f32.vlgmr.msra.gmra.mrb[0].mxu1 %v5178_v8 }
  0x5a   : > { %1228 = vmatmul.mubr.f32.vlgmr.msra.gmra.mrb[0].mxu0 %v3432_v1  ;;  %1007 = vmatprep.mubr.f32.mxu1 %v3165_v9  ;;  %v3702_v17 = vadd.f32 %v3263_v48, %v310_v54  ;;  %v906_v54 = vld [vmem:[%s5173_s1 + $0x380] sm:$0xff] }
  0x5b   : > { %2619 = vmatpush1.bf16.msra.mxu0 %v2618_v4  ;;  %1232 = vmatprep.mubr.f32.mxu0 %v3408_v55  ;;  %v866_v4 = vld [vmem:[%s5173_s1 + $0x240] sm:$0xff] }
  0x5c   : > { %2620 = vmatprep.subr.bf16.mxu0 %v5180_v3  ;;  %2761 = vmatpush1.bf16.msra.mxu1 %v3447_v13  ;;  %v2630_v20 = vpack.c.bf16 %v867_v5, %v866_v4  ;;  %v666_v4 = vrot.slane %v3602_v23, 2  ;;  %v2636_v5 = vpack.c.bf16 %v871_v51, %v870_v45  ;;  %5283 = vst [vmem:[#allocation18_spill] sm:$0xff] %v3702_v17  ;;  %v3730_v36 = vsel %vm414_vm0, %v3702_v17, 0.0  ;;  %v254_v51 = vld [vmem:[%s3235_s9 + $0xa0] sm:$0x3] }
  0x5d   : > { %1008 = vmatmul.mubr.f32.gmra.mrb[2].mxu1 %v5178_v8  ;;  %2746 = vmatprep.subr.bf16.mxu1 %v5180_v3  ;;  %v313_v45 = vmul.f32 %v3257_v46, %v252_v28  ;;  %v560_v58 = vrot.slane %v3730_v36, 1  ;;  %v909_v28 = vld [vmem:[%s5173_s1 + $0x398] sm:$0xff] }
  0x5e   : > { %1233 = vmatmul.mubr.f32.gmra.mrb[2].mxu0 %v3432_v1  ;;  %1012 = vmatprep.mubr.f32.mxu1 %v3468_v21  ;;  %v3724_v30 = vsel %vm647_vm3, %v664_v32, %v666_v4 }
  0x5f   : > { %2355 = vmatprep.mubr.msk.f32.mxu0 %vm414_vm0, %v3451_v14  ;;  %2622 = vmatpush1.bf16.msra.mxu0 %v2621_v22  ;;  %v3598_v22 = vadd.f32 %v3263_v48, %v307_v0  ;;  %v3677_v0 = vsel %vm647_vm3, %v663_v31, %v664_v32  ;;  %v558_v31 = vrot.slane %v3685_v7, 1  ;;  %v875_v32 = vld [vmem:[%s5173_s1 + $0x288] sm:$0xff] }
  0x60   : > { %2623 = vmatprep.subr.bf16.mxu0 %v5180_v3  ;;  %2762 = vmatpush1.bf16.msra.mxu1 %v3485_v29 }
  0x61   : > { %2339 = vmatmul.mubr.msk.f32.gmra.mrb[4].mxu1 %vm414_vm0, %v3274_v53  ;;  %2747 = vmatprep.subr.bf16.mxu1 %v5180_v3  ;;  %v3543_v53 = vsel %vm647_vm3, %v654_v18, %v656_v35  ;;  %v551_v18 = vrot.slane %v3553_v60, 1  ;;  %5280 = vst [vmem:[#allocation15_spill] sm:$0xff] %v3598_v22  ;;  %v3635_v35 = vsel %vm414_vm0, %v3598_v22, 0.0 }
  0x62   : > { %1238 = vmatmul.mubr.f32.gmra.mrb[4].mxu0 %v3500_v34  ;;  %1017 = vmatprep.mubr.f32.mxu1 %v3508_v38  ;;  %v668_v24 = vrot.slane %v3635_v35, 2 }
  0x63   : > { %1242 = vmatprep.mubr.f32.mxu0 %v3463_v19  ;;  %2625 = vmatpush1.bf16.msra.mxu0 %v2624_v40  ;;  %v3680_v2 = vsel %vm534_vm2, %v551_v18, %v553_v41 }
  0x64   : > { %2626 = vmatprep.subr.bf16.mxu0 %v5180_v3  ;;  %2763 = vmatpush1.bf16.msra.mxu1 %v3524_v47  ;;  %v3763_v63 = vsel %vm647_vm3, %v668_v24, %v669_v25  ;;  %v908_v24 = vld [vmem:[%s5173_s1 + $0x390] sm:$0xff] }
  0x65   : > { %1018 = vmatmul.mubr.f32.gmra.mrb[6].mxu1 %v3408_v55  ;;  %2748 = vmatprep.subr.bf16.mxu1 %v5180_v3  ;;  %v550_v55 = vrot.slane %v3558_v61, 1  ;;  %v555_v61 = vrot.slane %v3635_v35, 1  ;;  %v253_v35 = vld [vmem:[%s3235_s9 + $0x98] sm:$0xff] }
  0x66   : > { %1243 = vmatmul.mubr.f32.gmra.mrb[6].mxu0 %v3543_v53  ;;  %1022 = vmatprep.mubr.f32.mxu1 %v3546_v56 }
  0x67   : > { %2356 = vmatprep.mubr.msk.f32.mxu0 %vm414_vm0, %v3530_v49  ;;  %2628 = vmatpush1.bf16.msra.mxu0 %v2627_v62  ;;  %v3643_v40 = vsel %vm534_vm2, %v550_v55, %v551_v18  ;;  %v556_v62 = vrot.slane %v3630_v33, 1  ;;  %v873_v55 = vld [vmem:[%s5173_s1 + $0x278] sm:$0xff]  ;;  %v904_v18 = vld [vmem:[%s5173_s1 + $0x370] sm:$0xff] }
  0x68   : > { %2629 = vmatprep.subr.bf16.mxu0 %v5180_v3  ;;  %2764 = vmatpush1.bf16.msra.mxu1 %v3571_v6  ;;  %v2639_v41 = vpack.c.bf16 %v873_v55, %v872_v11  ;;  %v3771_v11 = vsel %vm425_vm1, %v373_v42, 0.0  ;;  %v315_v55 = vmul.f32 %v3257_v46, %v254_v51 }
  0x69   : > { %2340 = vmatmul.mubr.msk.f32.gmra.mrb[8].mxu1 %vm414_vm0, %v3451_v14  ;;  %2749 = vmatprep.subr.bf16.mxu1 %v5180_v3  ;;  %v3714_v23 = vsel %vm534_vm2, %v555_v61, %v556_v62  ;;  %v314_v61 = vmul.f32 %v3257_v46, %v253_v35  ;;  %v3766_v4 = vsel %vm534_vm2, %v556_v62, %v558_v31  ;;  %v877_v62 = vld [vmem:[%s5173_s1 + $0x298] sm:$0xff]  ;;  %v673_v35 = vrot.slane %v3730_v36, 2 }
  0x6a   : > { %1248 = vmatmul.mubr.f32.gmra.mrb[8].mxu0 %v3585_v12  ;;  %1027 = vmatprep.mubr.f32.mxu1 %v3593_v16  ;;  %5286 = vst [vmem:[#allocation21_spill] sm:$0xff] %v3766_v4  ;;  %v3800_v31 = vsel %vm534_vm2, %v560_v58, %v561_v59  ;;  %v878_v58 = vld [vmem:[%s5173_s1 + $0x2a0] sm:$0xff] }
  0x6b   : > { %1252 = vmatprep.mubr.f32.mxu0 %v3553_v60  ;;  %2631 = vmatpush1.bf16.msra.mxu0 %v2630_v20  ;;  %v905_v20 = vld [vmem:[%s5173_s1 + $0x378] sm:$0xff]  ;;  %5288 = vst [vmem:[#allocation23_spill] sm:$0xff] %v3800_v31  ;;  %v3805_v42 = vadd.f32 %v3263_v48, %v314_v61  ;;  %v3828_v61 = vpack.c.bf16 %v909_v28, %v908_v24  ;;  %v676_v24 = vrot.slane %v3771_v11, 2 }
  0x6c   : > { %2632 = vmatprep.subr.bf16.mxu0 %v5180_v3  ;;  %2765 = vmatpush1.bf16.msra.mxu1 %v3613_v27  ;;  %v3742_v44 = vpack.c.bf16 %v905_v20, %v904_v18  ;;  %v876_v18 = vld [vmem:[%s5173_s1 + $0x290] sm:$0xff]  ;;  %v3788_v20 = vadd.f32 %v3263_v48, %v313_v45  ;;  %v563_v45 = vrot.slane %v3771_v11, 1 }
  0x6d   : > { %1028 = vmatmul.mubr.f32.gmra.mrb[10].mxu1 %v3463_v19  ;;  %2750 = vmatprep.subr.bf16.mxu1 %v5180_v3  ;;  %v2645_v36 = vpack.c.bf16 %v877_v62, %v876_v18  ;;  %5289 = vst [vmem:[#allocation24_spill] sm:$0xff] %v3828_v61  ;;  %v911_v18 = vld [vmem:[%s5173_s1 + $0x3a8] sm:$0xff] }
  0x6e   : > { %1253 = vmatmul.mubr.f32.gmra.mrb[10].mxu0 %v3640_v37  ;;  %1032 = vmatprep.mubr.f32.mxu1 %v3643_v40  ;;  %5285 = vst [vmem:[#allocation20_spill] sm:$0xff] %v3742_v44  ;;  %v3816_v51 = vsel %vm414_vm0, %v3788_v20, 0.0  ;;  %v3852_v8 = vsel %vm534_vm2, %v561_v59, %v563_v45  ;;  %v881_v59 = vld [vmem:[%s5173_s1 + $0x2b8] sm:$0xff] }
  0x6f   : > { %2357 = vmatprep.mubr.msk.f32.mxu0 %vm414_vm0, %v3598_v22  ;;  %2634 = vmatpush1.bf16.msra.mxu0 %v2633_v43  ;;  %v874_v43 = vld [vmem:[%s5173_s1 + $0x280] sm:$0xff]  ;;  %v565_v28 = vrot.slane %v3816_v51, 1  ;;  %5291 = vst [vmem:[#allocation26_spill] sm:$0xff] %v3852_v8 }
  0x70   : > { %2635 = vmatprep.subr.bf16.mxu0 %v5180_v3  ;;  %2766 = vmatpush1.bf16.msra.mxu1 %v3656_v52  ;;  %v2642_v10 = vpack.c.bf16 %v875_v32, %v874_v43  ;;  %v255_v43 = vld [vmem:[%s3235_s9 + $0xa8] sm:$0xff] }
  0x71   : > { %2341 = vmatmul.mubr.msk.f32.gmra.mrb[12].mxu1 %vm414_vm0, %v3530_v49  ;;  %2751 = vmatprep.subr.bf16.mxu1 %v5180_v3  ;;  %v882_v49 = vld [vmem:[%s5173_s1 + $0x2c0] sm:$0xff] }
  0x72   : > { %1258 = vmatmul.mubr.f32.gmra.mrb[12].mxu0 %v3677_v0  ;;  %1037 = vmatprep.mubr.f32.mxu1 %v3680_v2 }
  0x73   : > { %1262 = vmatprep.mubr.f32.mxu0 %v3630_v33  ;;  %2637 = vmatpush1.bf16.msra.mxu0 %v2636_v5  ;;  %v671_v5 = vrot.slane %v3685_v7, 2  ;;  %v3782_v7 = vpack.c.bf16 %v907_v57, %v906_v54  ;;  %v376_v54 = vadd.f32 %v3263_v48, %v315_v55  ;;  %v256_v57 = vld [vmem:[%s3235_s9 + $0xb0] sm:$0xff]  ;;  %v910_v55 = vld [vmem:[%s5173_s1 + $0x3a0] sm:$0xff] }
  0x74   : > { %2638 = vmatprep.subr.bf16.mxu0 %v5180_v3  ;;  %2767 = vmatpush1.bf16.msra.mxu1 %v3696_v15  ;;  %v3868_v45 = vpack.c.bf16 %v911_v18, %v910_v55  ;;  %v679_v55 = vrot.slane %v3805_v42, 2 }
  0x75   : > { %1038 = vmatmul.mubr.f32.gmra.mrb[14].mxu1 %v3553_v60  ;;  %2752 = vmatprep.subr.bf16.mxu1 %v5180_v3  ;;  %5287 = vst [vmem:[#allocation22_spill] sm:$0xff] %v3782_v7  ;;  %v3810_v32 = vsel %vm647_vm3, %v669_v25, %v671_v5  ;;  %v879_v25 = vld [vmem:[%s5173_s1 + $0x2a8] sm:$0xff]  ;;  %v316_v5 = vmul.f32 %v3257_v46, %v255_v43  ;;  %v566_v43 = vrot.slane %v3805_v42, 1 }
  0x76   : > { %1263 = vmatmul.mubr.f32.gmra.mrb[14].mxu0 %v3724_v30  ;;  %1042 = vmatprep.mubr.f32.mxu1 %v3714_v23  ;;  %v2648_v1 = vpack.c.bf16 %v879_v25, %v878_v58  ;;  %5293 = vst [vmem:[#allocation27_spill] sm:$0xff] %v3868_v45  ;;  %v913_v58 = vld [vmem:[%s5173_s1 + $0x3b8] sm:$0xff] }
  0x77   : > { %2358 = vmatprep.mubr.msk.f32.mxu0 %vm414_vm0, %v3702_v17  ;;  %2640 = vmatpush1.bf16.msra.mxu0 %v2639_v41  ;;  %v674_v41 = vrot.slane %v3719_v26, 2 }
  0x78   : > { %2641 = vmatprep.subr.bf16.mxu0 %v5180_v3  ;;  %2768 = vmatpush1.bf16.msra.mxu1 %v3742_v44 }
  0x79   : > { %2342 = vmatmul.mubr.msk.f32.gmra.mrb[16].mxu1 %vm414_vm0, %v3598_v22  ;;  %2753 = vmatprep.subr.bf16.mxu1 %v5180_v3  ;;  %v3843_v62 = vsel %vm647_vm3, %v673_v35, %v674_v41  ;;  %v3857_v35 = vsel %vm425_vm1, %v376_v54, 0.0  ;;  %v880_v22 = vld [vmem:[%s5173_s1 + $0x2b0] sm:$0xff]  ;;  %v258_v54 = vld [vmem:[%s3235_s9 + $0xc0] sm:$0xff]  ;;  %v3887_v25 = vsel %vm647_vm3, %v674_v41, %v676_v24  ;;  %v259_v24 = vld [vmem:[%s3235_s9 + $0xc8] sm:$0xff] }
  0x7a   : > { %1268 = vmatmul.mubr.f32.gmra.mrb[16].mxu0 %v3763_v63  ;;  %1047 = vmatprep.mubr.f32.mxu1 %v3766_v4  ;;  %5290 = vst [vmem:[#allocation25_spill] sm:$0xff] %v3843_v62  ;;  %5294 = vst [vmem:[#allocation28_spill] sm:$0xff] %v3887_v25  ;;  %v568_v18 = vrot.slane %v3857_v35, 1 }
  0x7b   : > { %1272 = vmatprep.mubr.f32.mxu0 %v3719_v26  ;;  %2643 = vmatpush1.bf16.msra.mxu0 %v2642_v10  ;;  %v257_v10 = vld [vmem:[%s3235_s9 + $0xb8] sm:$0x3] }
  0x7c   : > { %2644 = vmatprep.subr.bf16.mxu0 %v5180_v3  ;;  %2769 = vmatpush1.bf16.msra.mxu1 %v3782_v7  ;;  %v318_v11 = vmul.f32 %v3257_v46, %v257_v10  ;;  %v678_v10 = vrot.slane %v3816_v51, 2  ;;  %v319_v51 = vmul.f32 %v3257_v46, %v258_v54  ;;  %v886_v7 = vld [vmem:[%s5173_s1 + $0x2e0] sm:$0xff] }
  0x7d   : > { %1048 = vmatmul.mubr.f32.gmra.mrb[18].mxu1 %v3630_v33  ;;  %2754 = vmatprep.subr.bf16.mxu1 %v5180_v3  ;;  %v317_v3 = vmul.f32 %v3257_v46, %v256_v57  ;;  %v5292_v33 = vmov 0.0|0.0   ;;  %v912_v57 = vld [vmem:[%s5173_s1 + $0x3b0] sm:$0xff] }
  0x7e   : > { %1273 = vmatmul.mubr.f32.gmra.mrb[18].mxu0 %v3810_v32  ;;  %1052 = vmatprep.mubr.f32.mxu1 %v3800_v31  ;;  %v379_v60 = vadd.f32 %v3263_v48, %v318_v11  ;;  %v3915_v19 = vpack.c.bf16 %v913_v58, %v912_v57  ;;  %v915_v11 = vld [vmem:[%s5173_s1 + $0x3c8] sm:$0xff]  ;;  %v320_v57 = vmul.f32 %v3257_v46, %v259_v24 }
  0x7f   : > { %2359 = vmatprep.mubr.msk.f32.mxu0 %vm414_vm0, %v3788_v20  ;;  %2646 = vmatpush1.bf16.msra.mxu0 %v2645_v36  ;;  %v3874_v36 = vadd.f32 %v3263_v48, %v316_v5  ;;  %v3890_v5 = vsel %vm534_vm2, %v565_v28, %v566_v43  ;;  %v2651_v28 = vpack.c.bf16 %v881_v59, %v880_v22  ;;  %v914_v22 = vld [vmem:[%s5173_s1 + $0x3c0] sm:$0xff] }
  0x80   : > { %2647 = vmatprep.subr.bf16.mxu0 %v5292_v33  ;;  %2770 = vmatpush1.bf16.msra.mxu1 %v3828_v61  ;;  %5295 = vst [vmem:[#allocation29_spill] sm:$0xff] %v3915_v19  ;;  %v3929_v59 = vsel %vm647_vm3, %v678_v10, %v679_v55  ;;  %v3937_v58 = vsel %vm534_vm2, %v566_v43, %v568_v18  ;;  %v3946_v24 = vsel %vm425_vm1, %v379_v60, 0.0  ;;  %v884_v43 = vld [vmem:[%s5173_s1 + $0x2d0] sm:$0xff]  ;;  %v261_v60 = vld [vmem:[%s3235_s9 + $0xd8] sm:$0xff] }
  0x81   : > { %2343 = vmatmul.mubr.msk.f32.gmra.mrb[20].mxu1 %vm414_vm0, %v3702_v17  ;;  %2755 = vmatprep.subr.bf16.mxu1 %v5292_v33  ;;  %v3897_v17 = vadd.f32 %v3263_v48, %v317_v3  ;;  %v3902_v41 = vsel %vm414_vm0, %v3874_v36, 0.0  ;;  %v883_v3 = vld [vmem:[%s5173_s1 + $0x2c8] sm:$0xff]  ;;  %5296 = vst [vmem:[#allocation30_spill] sm:$0xff] %v3929_v59  ;;  %v3942_v10 = vadd.f32 %v3263_v48, %v319_v51  ;;  %v916_v18 = vld [vmem:[%s5173_s1 + $0x3d0] sm:$0xff] }
  0x82   : > { %1278 = vmatmul.mubr.f32.gmra.mrb[20].mxu0 %v3843_v62  ;;  %1057 = vmatprep.mubr.f32.mxu1 %v3852_v8  ;;  %v570_v54 = vrot.slane %v3902_v41, 1  ;;  %v2654_v9 = vpack.c.bf16 %v883_v3, %v882_v49  ;;  %v3957_v49 = vpack.c.bf16 %v915_v11, %v914_v22  ;;  %v683_v51 = vrot.slane %v3902_v41, 2  ;;  %v262_v8 = vld [vmem:[%s3235_s9 + $0xe0] sm:$0xff]  ;;  %v265_v62 = vld [vmem:[%s3235_s9 + $0xf8] sm:$0xff] }
  0x83   : > { %1282 = vmatprep.mubr.f32.mxu0 %v3805_v42  ;;  %2649 = vmatpush1.bf16.msra.mxu0 %v2648_v1  ;;  %v260_v1 = vld [vmem:[%s3235_s9 + $0xd0] sm:$0x3]  ;;  %v571_v14 = vrot.slane %v3897_v17, 1  ;;  %v684_v3 = vrot.slane %v3897_v17, 2  ;;  %v3980_v22 = vsel %vm414_vm0, %v3942_v10, 0.0  ;;  %v573_v41 = vrot.slane %v3946_v24, 1 }
  0x84   : > { %2650 = vmatprep.subr.bf16.mxu0 %v5292_v33  ;;  %2771 = vmatpush1.bf16.msra.mxu1 %v3868_v45  ;;  %v321_v45 = vmul.f32 %v3257_v46, %v260_v1  ;;  %5297 = vst [vmem:[#allocation31_spill] sm:$0xff] %v3957_v49  ;;  %v3975_v1 = vadd.f32 %v3263_v48, %v320_v57 }
  0x85   : > { %1058 = vmatmul.mubr.f32.gmra.mrb[22].mxu1 %v3719_v26  ;;  %2756 = vmatprep.subr.bf16.mxu1 %v5292_v33  ;;  %v681_v26 = vrot.slane %v3857_v35, 2  ;;  %v885_v35 = vld [vmem:[%s5173_s1 + $0x2d8] sm:$0xff]  ;;  %v322_v57 = vmul.f32 %v3257_v46, %v261_v60 }
  0x86   : > { %1283 = vmatmul.mubr.f32.gmra.mrb[22].mxu0 %v3887_v25  ;;  %1062 = vmatprep.mubr.f32.mxu1 %v3890_v5  ;;  %v2657_v61 = vpack.c.bf16 %v885_v35, %v884_v43  ;;  %v4015_v43 = vsel %vm647_vm3, %v683_v51, %v684_v3  ;;  %v575_v35 = vrot.slane %v3980_v22, 1  ;;  %v576_v60 = vrot.slane %v3975_v1, 1 }
  0x87   : > { %2360 = vmatprep.mubr.msk.f32.mxu0 %vm414_vm0, %v3874_v36  ;;  %2652 = vmatpush1.bf16.msra.mxu0 %v2651_v28  ;;  %v917_v28 = vld [vmem:[%s5173_s1 + $0x3d8] sm:$0xff]  ;;  %v3984_v11 = vsel %vm647_vm3, %v679_v55, %v681_v26  ;;  %v887_v26 = vld [vmem:[%s5173_s1 + $0x2e8] sm:$0xff]  ;;  %5300 = vst [vmem:[#allocation34_spill] sm:$0xff] %v4015_v43  ;;  %v4028_v51 = vadd.f32 %v3263_v48, %v322_v57  ;;  %v689_v57 = vrot.slane %v3975_v1, 2 }
  0x88   : > { %2653 = vmatprep.subr.bf16.mxu0 %v5292_v33  ;;  %2772 = vmatpush1.bf16.msra.mxu1 %v3915_v19  ;;  %5298 = vst [vmem:[#allocation32_spill] sm:$0xff] %v3984_v11  ;;  %v3987_v19 = vsel %vm534_vm2, %v570_v54, %v571_v14  ;;  %v4001_v55 = vpack.c.bf16 %v917_v28, %v916_v18  ;;  %v919_v54 = vld [vmem:[%s5173_s1 + $0x3e8] sm:$0xff]  ;;  %v686_v28 = vrot.slane %v3946_v24, 2 }
  0x89   : > { %2344 = vmatmul.mubr.msk.f32.gmra.mrb[24].mxu1 %vm414_vm0, %v3788_v20  ;;  %2757 = vmatprep.subr.bf16.mxu1 %v5292_v33  ;;  %v4023_v18 = vsel %vm534_vm2, %v571_v14, %v573_v41  ;;  %v888_v14 = vld [vmem:[%s5173_s1 + $0x2f0] sm:$0xff]  ;;  %v4056_v24 = vsel %vm534_vm2, %v575_v35, %v576_v60  ;;  %v688_v41 = vrot.slane %v3980_v22, 2 }
  0x8a   : > { %1288 = vmatmul.mubr.f32.gmra.mrb[24].mxu0 %v3929_v59  ;;  %1067 = vmatprep.mubr.f32.mxu1 %v3937_v58  ;;  %v382_v59 = vadd.f32 %v3263_v48, %v321_v45  ;;  %5299 = vst [vmem:[#allocation33_spill] sm:$0xff] %v4001_v55  ;;  %v918_v45 = vld [vmem:[%s5173_s1 + $0x3e0] sm:$0xff] }
  0x8b   : > { %1292 = vmatprep.mubr.f32.mxu0 %v3897_v17  ;;  %2655 = vmatpush1.bf16.msra.mxu0 %v2654_v9  ;;  %v263_v9 = vld [vmem:[%s3235_s9 + $0xe8] sm:$0x3] }
  0x8c   : > { %2656 = vmatprep.subr.bf16.mxu0 %v5292_v33  ;;  %2773 = vmatpush1.bf16.msra.mxu1 %v3957_v49  ;;  %v323_v49 = vmul.f32 %v3257_v46, %v262_v8  ;;  %v458_v25 = vsel %vm425_vm1, %v382_v59, 0.0  ;;  %v324_v31 = vmul.f32 %v3257_v46, %v263_v9  ;;  %v889_v8 = vld [vmem:[%s5173_s1 + $0x2f8] sm:$0xff]  ;;  %v922_v9 = vld [vmem:[%s5173_s1 + $0x400] sm:$0xff] }
  0x8d   : > { %1068 = vmatmul.mubr.f32.gmra.mrb[26].mxu1 %v3805_v42  ;;  %2758 = vmatprep.subr.bf16.mxu1 %v5292_v33  ;;  %v921_v59 = vld [vmem:[%s5173_s1 + $0x3f8] sm:$0xff]  ;;  %v578_v22 = vrot.slane %v458_v25, 1 }
  0x8e   : > { %1293 = vmatmul.mubr.f32.gmra.mrb[26].mxu0 %v3984_v11  ;;  %1072 = vmatprep.mubr.f32.mxu1 %v3987_v19  ;;  %v2660_v11 = vpack.c.bf16 %v887_v26, %v886_v7  ;;  %v4041_v7 = vpack.c.bf16 %v919_v54, %v918_v45  ;;  %v459_v26 = vsel %vm414_vm0, %v4028_v51, 0.0  ;;  %v923_v45 = vld [vmem:[%s5173_s1 + $0x408] sm:$0xff]  ;;  %v4071_v54 = vsel %vm647_vm3, %v684_v3, %v686_v28  ;;  %v266_v3 = vld [vmem:[%s3235_s9 + $0x100] sm:$0x3] }
  0x8f   : > { %2361 = vmatprep.mubr.msk.f32.mxu0 %vm414_vm0, %v3942_v10  ;;  %2658 = vmatpush1.bf16.msra.mxu0 %v2657_v61  ;;  %v920_v61 = vld [vmem:[%s5173_s1 + $0x3f0] sm:$0xff]  ;;  %5302 = vst [vmem:[#allocation36_spill] sm:$0xff] %v4071_v54  ;;  %v4074_v35 = vadd.f32 %v3263_v48, %v323_v49  ;;  %v385_v44 = vadd.f32 %v3263_v48, %v324_v31  ;;  %v580_v31 = vrot.slane %v459_v26, 1 }
  0x90   : > { %2659 = vmatprep.subr.bf16.mxu0 %v5292_v33  ;;  %2774 = vmatpush1.bf16.msra.mxu1 %v4001_v55  ;;  %5301 = vst [vmem:[#allocation35_spill] sm:$0xff] %v4041_v7  ;;  %v264_v55 = vld [vmem:[%s3235_s9 + $0xf0] sm:$0xff]  ;;  %v4081_v4 = vpack.c.bf16 %v921_v59, %v920_v61  ;;  %v4086_v28 = vpack.c.bf16 %v923_v45, %v922_v9  ;;  %v4104_v61 = vld [vmem:[%s5174_s2] ss:$0 sm:$0xff] }
  0x91   : > { %2345 = vmatmul.mubr.msk.f32.gmra.mrb[28].mxu1 %vm414_vm0, %v3874_v36  ;;  %2759 = vmatprep.subr.bf16.mxu1 %v5292_v33  ;;  %5303 = vst [vmem:[#allocation37_spill] sm:$0xff] %v4074_v35  ;;  %v4091_v48 = vsel %vm647_vm3, %v688_v41, %v689_v57  ;;  %v325_v49 = vmul.f32 %v3257_v46, %v264_v55  ;;  %v461_v46 = vsel %vm425_vm1, %v385_v44, 0.0  ;;  %v4121_v44 = vld [vmem:[%s5175_s3] ss:$0 sm:$0xff] }
  0x92   : > { %1298 = vmatmul.mubr.f32.gmra.mrb[28].mxu0 %v4015_v43  ;;  %1077 = vmatprep.mubr.f32.mxu1 %v4023_v18  ;;  %v2663_v43 = vpack.c.bf16 %v889_v8, %v888_v14  ;;  %5304 = vst [vmem:[#allocation38_spill] sm:$0xff] %v4081_v4  ;;  %5305 = vst [vmem:[#allocation39_spill] sm:$0xff] %v4091_v48  ;;  %v691_v14 = vrot.slane %v458_v25, 2  ;;  %v581_v8 = vrot.slane %v4074_v35, 1  ;;  %v693_v25 = vrot.slane %v459_v26, 2 }
  0x93   : > { %1302 = vmatprep.mubr.f32.mxu0 %v3975_v1  ;;  %2661 = vmatpush1.bf16.msra.mxu0 %v2660_v11  ;;  %v4098_v11 = vsel %vm534_vm2, %v576_v60, %v578_v22  ;;  %v326_v59 = vmul.f32 %v4104_v61, %v265_v62  ;;  %v327_v55 = vmul.f32 %v4104_v61, %v266_v3  ;;  %v583_v9 = vrot.slane %v461_v46, 1  ;;  %v267_v22 = vld [vmem:[%s3235_s9 + $0x108] sm:$0xff] }
  0x94   : > { %2662 = vmatprep.subr.bf16.mxu0 %v5292_v33  ;;  %2775 = vmatpush1.bf16.msra.mxu1 %v4041_v7  ;;  %v4124_v62 = vadd.f32 %v4121_v44, %v325_v49  ;;  %v4129_v60 = vsel %vm647_vm3, %v689_v57, %v691_v14  ;;  %v4132_v41 = vsel %vm534_vm2, %v580_v31, %v581_v8  ;;  %v268_v49 = vld [vmem:[%s3235_s9 + $0x110] sm:$0xff]  ;;  %v696_v31 = vrot.slane %v461_v46, 2 }
  0x95   : > { %1078 = vmatmul.mubr.f32.gmra.mrb[30].mxu1 %v3897_v17  ;;  %2760 = vmatprep.subr.bf16.mxu1 %v5292_v33  ;;  %5307 = vst [vmem:[#allocation41_spill] sm:$0xff] %v4129_v60  ;;  %v4135_v45 = vadd.f32 %v4121_v44, %v326_v59  ;;  %v388_v26 = vadd.f32 %v4121_v44, %v327_v55 }
  0x96   : > { %1303 = vmatmul.mubr.f32.gmra.mrb[30].mxu0 %v4071_v54  ;;  %1082 = vmatprep.mubr.f32.mxu1 %v4056_v24  ;;  %5306 = vst [vmem:[#allocation40_spill] sm:$0xff] %v4124_v62  ;;  %v462_v3 = vsel %vm414_vm0, %v4124_v62, 0.0  ;;  %v328_v14 = vmul.f32 %v4104_v61, %v267_v22  ;;  %v4155_v59 = vsel %vm534_vm2, %v581_v8, %v583_v9  ;;  %v271_v54 = vld [vmem:[%s3235_s9 + $0x128] sm:$0xff] }
  0x97   : > { %2362 = vmatprep.mubr.msk.f32.mxu0 %vm414_vm0, %v4028_v51  ;;  %2664 = vmatpush1.bf16.msra.mxu0 %v2663_v43  ;;  %v694_v43 = vrot.slane %v4074_v35, 2  ;;  %5308 = vst [vmem:[#allocation42_spill] sm:$0xff] %v4135_v45  ;;  %v585_v55 = vrot.slane %v462_v3, 1  ;;  %v586_v7 = vrot.slane %v4135_v45, 1  ;;  %v698_v9 = vrot.slane %v462_v3, 2 }
  0x98   : > { %2776 = vmatpush1.bf16.msra.mxu1 %v4081_v4  ;;  %2665 = vmatprep.subr.bf16.mxu0 %v5292_v33  ;;  %v269_v4 = vld [vmem:[%s3235_s9 + $0x118] sm:$0x3]  ;;  %v4168_v8 = vadd.f32 %v4121_v44, %v328_v14  ;;  %v699_v22 = vrot.slane %v4135_v45, 2 }
  0x99   : > { %2346 = vmatmul.mubr.msk.f32.gmra.mrb[32].mxu1 %vm414_vm0, %v3942_v10  ;;  %2714 = vmatprep.subr.bf16.mxu1 %v4086_v28  ;;  %v4148_v57 = vsel %vm647_vm3, %v693_v25, %v694_v43  ;;  %v464_v25 = vsel %vm425_vm1, %v388_v26, 0.0  ;;  %v330_v46 = vmul.f32 %v4104_v61, %v269_v4  ;;  %v4174_v4 = vsel %vm647_vm3, %v694_v43, %v696_v31  ;;  %v272_v43 = vld [vmem:[%s3235_s9 + $0x130] sm:$0x3] }
  0x9a   : > { %1308 = vmatmul.mubr.f32.gmra.mrb[32].mxu0 %v4091_v48  ;;  %1087 = vmatprep.mubr.f32.mxu1 %v4098_v11  ;;  %5309 = vst [vmem:[#allocation43_spill] sm:$0xff] %v4148_v57  ;;  %5310 = vst [vmem:[#allocation44_spill] sm:$0xff] %v4168_v8  ;;  %v4177_v26 = vsel %vm534_vm2, %v585_v55, %v586_v7  ;;  %v588_v48 = vrot.slane %v464_v25, 1  ;;  %v465_v3 = vsel %vm414_vm0, %v4168_v8, 0.0 }
  0x9b   : > { %1312 = vmatprep.mubr.f32.mxu0 %v4074_v35  ;;  %5311 = vst [vmem:[#allocation45_spill] sm:$0xff] %v4174_v4  ;;  %5312 = vst [vmem:[#allocation46_spill] sm:$0xff] %v4177_v26  ;;  %v391_v14 = vadd.f32 %v4121_v44, %v330_v46  ;;  %v4193_v31 = vsel %vm647_vm3, %v698_v9, %v699_v22  ;;  %v701_v46 = vrot.slane %v464_v25, 2 }
  0x9c   : > { %5314 = vst [vmem:[#allocation48_spill] sm:$0xff] %v4193_v31  ;;  %v4200_v55 = vsel %vm534_vm2, %v586_v7, %v588_v48  ;;  %v333_v9 = vmul.f32 %v4104_v61, %v272_v43  ;;  %v703_v7 = vrot.slane %v465_v3, 2 }
  0x9d   : > { %1088 = vmatmul.mubr.f32.gmra.mrb[34].mxu1 %v3975_v1  ;;  %5315 = vst [vmem:[#allocation49_spill] sm:$0xff] %v4200_v55 }
  0x9e   : > { %1313 = vmatmul.mubr.f32.gmra.mrb[34].mxu0 %v4129_v60  ;;  %1092 = vmatprep.mubr.f32.mxu1 %v4132_v41  ;;  %v329_v60 = vmul.f32 %v4104_v61, %v268_v49  ;;  %v270_v49 = vld [vmem:[%s3235_s9 + $0x120] sm:$0xff] }
  0x9f   : > { %2363 = vmatprep.mubr.msk.f32.mxu0 %vm414_vm0, %v4124_v62  ;;  %v331_v15 = vmul.f32 %v4104_v61, %v270_v49 }
  0xa1   : > { %2347 = vmatmul.mubr.msk.f32.gmra.mrb[36].mxu1 %vm414_vm0, %v4028_v51 }
  0xa2   : > { %1318 = vmatmul.mubr.f32.gmra.mrb[36].mxu0 %v4148_v57  ;;  %1097 = vmatprep.mubr.f32.mxu1 %v4155_v59  ;;  %v4180_v57 = vadd.f32 %v4121_v44, %v329_v60  ;;  %v332_v60 = vmul.f32 %v4104_v61, %v271_v54  ;;  %v4210_v54 = vadd.f32 %v4121_v44, %v331_v15 }
  0xa3   : > { %1322 = vmatprep.mubr.f32.mxu0 %v4135_v45 }
  0xa4   : > { %5313 = vst [vmem:[#allocation47_spill] sm:$0xff] %v4180_v57  ;;  %v591_v49 = vrot.slane %v4180_v57, 1  ;;  %5316 = vst [vmem:[#allocation50_spill] sm:$0xff] %v4210_v54  ;;  %v704_v48 = vrot.slane %v4180_v57, 2  ;;  %v4216_v25 = vadd.f32 %v4121_v44, %v332_v60  ;;  %v275_v60 = vld [vmem:[%s3235_s9 + $0x148] sm:$0x3] }
  0xa5   : > { %1098 = vmatmul.mubr.f32.gmra.mrb[38].mxu1 %v4074_v35  ;;  %v590_v35 = vrot.slane %v465_v3, 1  ;;  %v394_v3 = vadd.f32 %v4121_v44, %v333_v9 }
  0xa6   : > { %1323 = vmatmul.mubr.f32.gmra.mrb[38].mxu0 %v4174_v4  ;;  %1102 = vmatprep.mubr.f32.mxu1 %v4177_v26  ;;  %v467_v4 = vsel %vm425_vm1, %v391_v14, 0.0  ;;  %5317 = vst [vmem:[#allocation51_spill] sm:$0xff] %v4216_v25  ;;  %v4220_v14 = vsel %vm647_vm3, %v699_v22, %v701_v46  ;;  %v4236_v22 = vsel %vm647_vm3, %v703_v7, %v704_v48  ;;  %v596_v26 = vrot.slane %v4216_v25, 1 }
  0xa7   : > { %2364 = vmatprep.mubr.msk.f32.mxu0 %vm414_vm0, %v4168_v8  ;;  %5318 = vst [vmem:[#allocation52_spill] sm:$0xff] %v4220_v14  ;;  %v4223_v43 = vsel %vm534_vm2, %v590_v35, %v591_v49  ;;  %v593_v15 = vrot.slane %v467_v4, 1  ;;  %5320 = vst [vmem:[#allocation54_spill] sm:$0xff] %v4236_v22  ;;  %v470_v7 = vsel %vm425_vm1, %v394_v3, 0.0 }
  0xa8   : > { %5319 = vst [vmem:[#allocation53_spill] sm:$0xff] %v4223_v43 }
  0xa9   : > { %2348 = vmatmul.mubr.msk.f32.gmra.mrb[40].mxu1 %vm414_vm0, %v4124_v62  ;;  %v274_v62 = vld [vmem:[%s3235_s9 + $0x140] sm:$0xff]  ;;  %v4243_v9 = vsel %vm534_vm2, %v591_v49, %v593_v15  ;;  %v276_v49 = vld [vmem:[%s3235_s9 + $0x150] sm:$0xff] }
  0xaa   : > { %1328 = vmatmul.mubr.f32.gmra.mrb[40].mxu0 %v4193_v31  ;;  %1107 = vmatprep.mubr.f32.mxu1 %v4200_v55  ;;  %v468_v31 = vsel %vm414_vm0, %v4210_v54, 0.0  ;;  %v273_v55 = vld [vmem:[%s3235_s9 + $0x138] sm:$0xff]  ;;  %5321 = vst [vmem:[#allocation55_spill] sm:$0xff] %v4243_v9 }
  0xab   : > { %1332 = vmatprep.mubr.f32.mxu0 %v4180_v57  ;;  %v595_v35 = vrot.slane %v468_v31, 1  ;;  %v334_v46 = vmul.f32 %v4104_v61, %v273_v55  ;;  %v708_v55 = vrot.slane %v468_v31, 2 }
  0xad   : > { %1108 = vmatmul.mubr.f32.gmra.mrb[42].mxu1 %v4135_v45  ;;  %v706_v45 = vrot.slane %v467_v4, 2  ;;  %v4256_v4 = vadd.f32 %v4121_v44, %v334_v46  ;;  %v4265_v3 = vsel %vm534_vm2, %v595_v35, %v596_v26  ;;  %v711_v35 = vrot.slane %v470_v7, 2 }
  0xae   : > { %1333 = vmatmul.mubr.f32.gmra.mrb[42].mxu0 %v4220_v14  ;;  %1112 = vmatprep.mubr.f32.mxu1 %v4223_v43  ;;  %v335_v14 = vmul.f32 %v4104_v61, %v274_v62  ;;  %v336_v43 = vmul.f32 %v4104_v61, %v275_v60  ;;  %v709_v62 = vrot.slane %v4216_v25, 2  ;;  %5323 = vst [vmem:[#allocation57_spill] sm:$0xff] %v4265_v3  ;;  %v598_v60 = vrot.slane %v470_v7, 1 }
  0xaf   : > { %2365 = vmatprep.mubr.msk.f32.mxu0 %vm414_vm0, %v4210_v54  ;;  %v4262_v15 = vsel %vm647_vm3, %v704_v48, %v706_v45  ;;  %v471_v31 = vsel %vm414_vm0, %v4256_v4, 0.0  ;;  %v278_v45 = vld [vmem:[%s3235_s9 + $0x160] sm:$0x3] }
  0xb0   : > { %5322 = vst [vmem:[#allocation56_spill] sm:$0xff] %v4262_v15  ;;  %v397_v46 = vadd.f32 %v4121_v44, %v336_v43  ;;  %v4281_v48 = vsel %vm647_vm3, %v708_v55, %v709_v62  ;;  %v4288_v43 = vsel %vm534_vm2, %v596_v26, %v598_v60  ;;  %v339_v55 = vmul.f32 %v4104_v61, %v278_v45 }
  0xb1   : > { %2349 = vmatmul.mubr.msk.f32.gmra.mrb[44].mxu1 %vm414_vm0, %v4168_v8  ;;  %v337_v8 = vmul.f32 %v4104_v61, %v276_v49  ;;  %5325 = vst [vmem:[#allocation59_spill] sm:$0xff] %v4281_v48  ;;  %5326 = vst [vmem:[#allocation60_spill] sm:$0xff] %v4288_v43  ;;  %v713_v26 = vrot.slane %v471_v31, 2 }
  0xb2   : > { %1338 = vmatmul.mubr.f32.gmra.mrb[44].mxu0 %v4236_v22  ;;  %1117 = vmatprep.mubr.f32.mxu1 %v4243_v9  ;;  %v4268_v22 = vadd.f32 %v4121_v44, %v335_v14  ;;  %v277_v9 = vld [vmem:[%s3235_s9 + $0x158] sm:$0xff] }
  0xb3   : > { %1342 = vmatprep.mubr.f32.mxu0 %v4216_v25  ;;  %v338_v14 = vmul.f32 %v4104_v61, %v277_v9  ;;  %v4298_v9 = vadd.f32 %v4121_v44, %v337_v8 }
  0xb4   : > { %5324 = vst [vmem:[#allocation58_spill] sm:$0xff] %v4268_v22  ;;  %v601_v49 = vrot.slane %v4268_v22, 1  ;;  %v714_v7 = vrot.slane %v4268_v22, 2 }
  0xb5   : > { %1118 = vmatmul.mubr.f32.gmra.mrb[46].mxu1 %v4180_v57  ;;  %v600_v57 = vrot.slane %v471_v31, 1  ;;  %v4304_v60 = vadd.f32 %v4121_v44, %v338_v14  ;;  %v400_v31 = vadd.f32 %v4121_v44, %v339_v55  ;;  %v281_v14 = vld [vmem:[%s3235_s9 + $0x178] sm:$0x3] }
  0xb6   : > { %1343 = vmatmul.mubr.f32.gmra.mrb[46].mxu0 %v4262_v15  ;;  %1122 = vmatprep.mubr.f32.mxu1 %v4265_v3  ;;  %v473_v15 = vsel %vm425_vm1, %v397_v46, 0.0  ;;  %v4308_v46 = vsel %vm647_vm3, %v709_v62, %v711_v35  ;;  %v4324_v62 = vsel %vm647_vm3, %v713_v26, %v714_v7 }
  0xb7   : > { %2366 = vmatprep.mubr.msk.f32.mxu0 %vm414_vm0, %v4256_v4  ;;  %5327 = vst [vmem:[#allocation61_spill] sm:$0xff] %v4308_v46  ;;  %v4311_v45 = vsel %vm534_vm2, %v600_v57, %v601_v49  ;;  %v603_v8 = vrot.slane %v473_v15, 1  ;;  %5329 = vst [vmem:[#allocation63_spill] sm:$0xff] %v4324_v62  ;;  %v716_v3 = vrot.slane %v473_v15, 2  ;;  %v476_v26 = vsel %vm425_vm1, %v400_v31, 0.0 }
  0xb8   : > { %5328 = vst [vmem:[#allocation62_spill] sm:$0xff] %v4311_v45  ;;  %v608_v31 = vrot.slane %v476_v26, 1 }
  0xb9   : > { %2350 = vmatmul.mubr.msk.f32.gmra.mrb[48].mxu1 %vm414_vm0, %v4210_v54  ;;  %v280_v54 = vld [vmem:[%s3235_s9 + $0x170] sm:$0xff]  ;;  %v4331_v55 = vsel %vm534_vm2, %v601_v49, %v603_v8  ;;  %v719_v49 = vrot.slane %v4304_v60, 2 }
  0xba   : > { %1348 = vmatmul.mubr.f32.gmra.mrb[48].mxu0 %v4281_v48  ;;  %1127 = vmatprep.mubr.f32.mxu1 %v4288_v43  ;;  %v474_v48 = vsel %vm414_vm0, %v4298_v9, 0.0  ;;  %v279_v43 = vld [vmem:[%s3235_s9 + $0x168] sm:$0xff]  ;;  %5330 = vst [vmem:[#allocation64_spill] sm:$0xff] %v4331_v55 }
  0xbb   : > { %1352 = vmatprep.mubr.f32.mxu0 %v4268_v22  ;;  %v605_v57 = vrot.slane %v474_v48, 1  ;;  %v340_v35 = vmul.f32 %v4104_v61, %v279_v43  ;;  %v718_v43 = vrot.slane %v474_v48, 2 }
  0xbd   : > { %1128 = vmatmul.mubr.f32.gmra.mrb[50].mxu1 %v4216_v25  ;;  %v606_v25 = vrot.slane %v4304_v60, 1  ;;  %v4344_v15 = vadd.f32 %v4121_v44, %v340_v35 }
  0xbe   : > { %1353 = vmatmul.mubr.f32.gmra.mrb[50].mxu0 %v4308_v46  ;;  %1132 = vmatprep.mubr.f32.mxu1 %v4311_v45  ;;  %v341_v46 = vmul.f32 %v4104_v61, %v280_v54  ;;  %v342_v45 = vmul.f32 %v4104_v61, %v281_v14  ;;  %v4349_v54 = vsel %vm647_vm3, %v714_v7, %v716_v3 }
  0xbf   : > { %2367 = vmatprep.mubr.msk.f32.mxu0 %vm414_vm0, %v4298_v9  ;;  %5331 = vst [vmem:[#allocation65_spill] sm:$0xff] %v4349_v54  ;;  %v4352_v8 = vsel %vm534_vm2, %v605_v57, %v606_v25  ;;  %v477_v48 = vsel %vm414_vm0, %v4344_v15, 0.0  ;;  %v4366_v3 = vsel %vm647_vm3, %v718_v43, %v719_v49  ;;  %v721_v57 = vrot.slane %v476_v26, 2 }
  0xc0   : > { %v4355_v14 = vadd.f32 %v4121_v44, %v341_v46  ;;  %v403_v35 = vadd.f32 %v4121_v44, %v342_v45  ;;  %v4373_v46 = vsel %vm534_vm2, %v606_v25, %v608_v31  ;;  %v610_v45 = vrot.slane %v477_v48, 1 }
  0xc1   : > { %2351 = vmatmul.mubr.msk.f32.gmra.mrb[52].mxu1 %vm414_vm0, %v4256_v4  ;;  %v723_v25 = vrot.slane %v477_v48, 2  ;;  %v4390_v43 = vsel %vm647_vm3, %v719_v49, %v721_v57 }
  0xc2   : > { %1358 = vmatmul.mubr.f32.gmra.mrb[52].mxu0 %v4324_v62  ;;  %1137 = vmatprep.mubr.f32.mxu1 %v4331_v55  ;;  %v282_v62 = vld [vmem:[%s3235_s9 + $0x180] sm:$0xff]  ;;  %v283_v55 = vld [vmem:[%s3235_s9 + $0x188] sm:$0xff] }
  0xc3   : > { %1362 = vmatprep.mubr.f32.mxu0 %v4304_v60  ;;  %v343_v7 = vmul.f32 %v4104_v61, %v282_v62  ;;  %v344_v26 = vmul.f32 %v4104_v61, %v283_v55 }
  0xc5   : > { %1138 = vmatmul.mubr.f32.gmra.mrb[54].mxu1 %v4268_v22  ;;  %v611_v22 = vrot.slane %v4355_v14, 1  ;;  %v4385_v62 = vadd.f32 %v4121_v44, %v343_v7  ;;  %v4409_v48 = vadd.f32 %v4121_v44, %v344_v26  ;;  %v937_v26 = vld [vmem:[%s5173_s1 + $0x478] sm:$0xff] }
  0xc6   : > { %1363 = vmatmul.mubr.f32.gmra.mrb[54].mxu0 %v4349_v54  ;;  %1142 = vmatprep.mubr.f32.mxu1 %v4352_v8  ;;  %v479_v54 = vsel %vm425_vm1, %v403_v35, 0.0  ;;  %v724_v35 = vrot.slane %v4355_v14, 2 }
  0xc7   : > { %2368 = vmatprep.mubr.msk.f32.mxu0 %vm414_vm0, %v4344_v15  ;;  %v4393_v31 = vsel %vm534_vm2, %v610_v45, %v611_v22  ;;  %v613_v50 = vrot.slane %v479_v54, 1  ;;  %v726_v7 = vrot.slane %v479_v54, 2  ;;  %v926_v45 = vld [vmem:[%s5173_s1 + $0x420] sm:$0xff] }
  0xc8   : > { %v4403_v55 = vsel %vm647_vm3, %v723_v25, %v724_v35  ;;  %v927_v25 = vld [vmem:[%s5173_s1 + $0x428] sm:$0xff] }
  0xc9   : > { %2352 = vmatmul.mubr.msk.f32.gmra.mrb[56].mxu1 %vm414_vm0, %v4298_v9  ;;  %v4406_v49 = vsel %vm534_vm2, %v611_v22, %v613_v50  ;;  %v4418_v57 = vsel %vm647_vm3, %v724_v35, %v726_v7  ;;  %v924_v50 = vld [vmem:[%s5173_s1 + $0x410] sm:$0xff]  ;;  %v925_v22 = vld [vmem:[%s5173_s1 + $0x418] sm:$0xff] }
  0xca   : > { %1368 = vmatmul.mubr.f32.gmra.mrb[56].mxu0 %v4366_v3  ;;  %1147 = vmatprep.mubr.f32.mxu1 %v4373_v46  ;;  %v2717_v54 = vpack.c.bf16 %v925_v22, %v924_v50  ;;  %v5334_v35 = vld [vmem:[#allocation21_spill] sm:$0xff]  ;;  %v5335_v7 = vld [vmem:[#allocation46_spill] sm:$0xff]  ;;  %v5337_v50 = vld [vmem:[#allocation20_spill] sm:$0xff] }
  0xcb   : > { %1372 = vmatprep.mubr.f32.mxu0 %v4355_v14  ;;  %v5338_v22 = vld [vmem:[#allocation40_spill] sm:$0xff] }
  0xcd   : > { %1148 = vmatmul.mubr.f32.gmra.mrb[58].mxu1 %v4304_v60 }
  0xce   : > { %1373 = vmatmul.mubr.f32.gmra.mrb[58].mxu0 %v4390_v43  ;;  %1152 = vmatprep.mubr.f32.mxu1 %v4393_v31 }
  0xcf   : > { %2369 = vmatprep.mubr.msk.f32.mxu0 %vm414_vm0, %v4385_v62 }
  0xd1   : > { %2353 = vmatmul.mubr.msk.f32.gmra.mrb[60].mxu1 %vm414_vm0, %v4344_v15 }
  0xd2   : > { %1378 = vmatmul.mubr.f32.gmra.mrb[60].mxu0 %v4403_v55  ;;  %1157 = vmatprep.mubr.f32.mxu1 %v4406_v49 }
  0xd3   : > { %1382 = vmatprep.mubr.f32.mxu0 %v4409_v48 }
  0xd5   : > { %1158 = vmatmul.mubr.f32.gmra.mrb[62].mxu1 %v4355_v14 }
  0xd6   : > { %1383 = vmatmul.mubr.f32.gmra.mrb[62].mxu0 %v4418_v57  ;;  %1717 = vmatprep.mubr.f32.mxu1 %v3890_v5 }
  0xd7   : > { %1452 = vmatprep.mubr.f32.mxu0 %v3500_v34  ;;  %v928_v34 = vld [vmem:[%s5173_s1 + $0x430] sm:$0xff] }
  0xd9   : > { %2374 = vmatmul.mubr.msk.f32.vlgmr.msra.gmra.mrb[64].mxu1 %vm414_vm0, %v3788_v20 }
  0xda   : > { %1453 = vmatmul.mubr.f32.vlgmr.msra.gmra.mrb[0].mxu0 %v3468_v21  ;;  %1722 = vmatprep.mubr.f32.mxu1 %v3937_v58  ;;  %v2721_v21 = vpack.c.bf16 %v927_v25, %v926_v45  ;;  %v5340_v45 = vld [vmem:[#allocation49_spill] sm:$0xff]  ;;  %v5341_v25 = vld [vmem:[#allocation28_spill] sm:$0xff] }
  0xdb   : > { %2667 = vmatpush1.bf16.msra.mxu0 %v3447_v13  ;;  %1457 = vmatprep.mubr.f32.mxu0 %v3543_v53  ;;  %v929_v13 = vld [vmem:[%s5173_s1 + $0x438] sm:$0xff]  ;;  %v930_v53 = vld [vmem:[%s5173_s1 + $0x440] sm:$0xff] }
  0xdc   : > { %2668 = vmatprep.subr.bf16.mxu0 %v5292_v33  ;;  %2716 = vmatpush3.bf16.msra.mxu1 %v4086_v28  ;;  %v936_v28 = vld [vmem:[%s5173_s1 + $0x470] sm:$0xff] }
  0xdd   : > { %1723 = vmatmul.mubr.f32.gmra.mrb[66].mxu1 %v3805_v42  ;;  %2718 = vmatprep.subr.bf16.mxu1 %v2717_v54  ;;  %v932_v42 = vld [vmem:[%s5173_s1 + $0x450] sm:$0xff] }
  0xde   : > { %1458 = vmatmul.mubr.f32.gmra.mrb[2].mxu0 %v3508_v38  ;;  %1727 = vmatprep.mubr.f32.mxu1 %v3987_v19  ;;  %v2725_v38 = vpack.c.bf16 %v929_v13, %v928_v34  ;;  %v5343_v34 = vld [vmem:[#allocation42_spill] sm:$0xff] }
  0xdf   : > { %1462 = vmatprep.mubr.f32.mxu0 %v3585_v12  ;;  %2670 = vmatpush1.bf16.msra.mxu0 %v3485_v29  ;;  %v931_v29 = vld [vmem:[%s5173_s1 + $0x448] sm:$0xff]  ;;  %v5344_v13 = vld [vmem:[#allocation26_spill] sm:$0xff] }
  0xe0   : > { %2671 = vmatprep.subr.bf16.mxu0 %v5292_v33  ;;  %2720 = vmatpush3.bf16.msra.mxu1 %v2717_v54  ;;  %v2729_v20 = vpack.c.bf16 %v931_v29, %v930_v53  ;;  %v5339_v54 = vld [vmem:[#allocation23_spill] sm:$0xff]  ;;  %v5346_v53 = vld [vmem:[#allocation30_spill] sm:$0xff]  ;;  %v5347_v29 = vld [vmem:[#allocation24_spill] sm:$0xff] }
  0xe1   : > { %2375 = vmatmul.mubr.msk.f32.gmra.mrb[68].mxu1 %vm414_vm0, %v3874_v36  ;;  %2722 = vmatprep.subr.bf16.mxu1 %v2721_v21  ;;  %v933_v36 = vld [vmem:[%s5173_s1 + $0x458] sm:$0xff] }
  0xe2   : > { %1463 = vmatmul.mubr.f32.gmra.mrb[4].mxu0 %v3546_v56  ;;  %1732 = vmatprep.mubr.f32.mxu1 %v4023_v18 }
  0xe3   : > { %1467 = vmatprep.mubr.f32.mxu0 %v3640_v37  ;;  %2673 = vmatpush1.bf16.msra.mxu0 %v3524_v47  ;;  %v2733_v47 = vpack.c.bf16 %v933_v36, %v932_v42  ;;  %v5349_v42 = vld [vmem:[#allocation55_spill] sm:$0xff]  ;;  %v5350_v36 = vld [vmem:[#allocation32_spill] sm:$0xff] }
  0xe4   : > { %2674 = vmatprep.subr.bf16.mxu0 %v5292_v33  ;;  %2724 = vmatpush3.bf16.msra.mxu1 %v2721_v21  ;;  %v5342_v21 = vld [vmem:[#allocation22_spill] sm:$0xff] }
  0xe5   : > { %1733 = vmatmul.mubr.f32.gmra.mrb[70].mxu1 %v3897_v17  ;;  %2726 = vmatprep.subr.bf16.mxu1 %v2725_v38  ;;  %v934_v17 = vld [vmem:[%s5173_s1 + $0x460] sm:$0xff] }
  0xe6   : > { %1468 = vmatmul.mubr.f32.gmra.mrb[6].mxu0 %v3593_v16  ;;  %1737 = vmatprep.mubr.f32.mxu1 %v4056_v24 }
  0xe7   : > { %1472 = vmatprep.mubr.f32.mxu0 %v3677_v0  ;;  %2676 = vmatpush1.bf16.msra.mxu0 %v3571_v6  ;;  %v935_v6 = vld [vmem:[%s5173_s1 + $0x468] sm:$0xff] }
  0xe8   : > { %2677 = vmatprep.subr.bf16.mxu0 %v5292_v33  ;;  %2728 = vmatpush3.bf16.msra.mxu1 %v2725_v38  ;;  %v5345_v38 = vld [vmem:[#allocation53_spill] sm:$0xff] }
  0xe9   : > { %2376 = vmatmul.mubr.msk.f32.gmra.mrb[72].mxu1 %vm414_vm0, %v3942_v10  ;;  %2730 = vmatprep.subr.bf16.mxu1 %v2729_v20  ;;  %v2737_v10 = vpack.c.bf16 %v935_v6, %v934_v17  ;;  %v5352_v17 = vld [vmem:[#allocation47_spill] sm:$0xff]  ;;  %v5353_v6 = vld [vmem:[#allocation57_spill] sm:$0xff] }
  0xea   : > { %1473 = vmatmul.mubr.f32.gmra.mrb[8].mxu0 %v3643_v40  ;;  %1742 = vmatprep.mubr.f32.mxu1 %v4098_v11 }
  0xeb   : > { %1477 = vmatprep.mubr.f32.mxu0 %v3724_v30  ;;  %2679 = vmatpush1.bf16.msra.mxu0 %v3613_v27  ;;  %v2741_v27 = vpack.c.bf16 %v937_v26, %v936_v28  ;;  %v5355_v28 = vld [vmem:[#allocation29_spill] sm:$0xff]  ;;  %v5357_v26 = vld [vmem:[#allocation60_spill] sm:$0xff] }
  0xec   : > { %2680 = vmatprep.subr.bf16.mxu0 %v5292_v33  ;;  %2732 = vmatpush3.bf16.msra.mxu1 %v2729_v20  ;;  %v5348_v20 = vld [vmem:[#allocation44_spill] sm:$0xff] }
  0xed   : > { %1743 = vmatmul.mubr.f32.gmra.mrb[74].mxu1 %v3975_v1  ;;  %2734 = vmatprep.subr.bf16.mxu1 %v2733_v47  ;;  %v5332_v1 = vld [vmem:[#allocation17_spill] sm:$0xff] }
  0xee   : > { %1478 = vmatmul.mubr.f32.gmra.mrb[10].mxu0 %v3680_v2  ;;  %1747 = vmatprep.mubr.f32.mxu1 %v4132_v41 }
  0xef   : > { %1482 = vmatprep.mubr.f32.mxu0 %v3763_v63  ;;  %2682 = vmatpush1.bf16.msra.mxu0 %v3656_v52  ;;  %v5333_v52 = vld [vmem:[#allocation37_spill] sm:$0xff] }
  0xf0   : > { %2683 = vmatprep.subr.bf16.mxu0 %v5292_v33  ;;  %2736 = vmatpush3.bf16.msra.mxu1 %v2733_v47  ;;  %v5351_v47 = vld [vmem:[#allocation27_spill] sm:$0xff] }
  0xf1   : > { %2377 = vmatmul.mubr.msk.f32.gmra.mrb[76].mxu1 %vm414_vm0, %v4028_v51  ;;  %2738 = vmatprep.subr.bf16.mxu1 %v2737_v10  ;;  %v5336_v51 = vld [vmem:[#allocation25_spill] sm:$0xff] }
  0xf2   : > { %1483 = vmatmul.mubr.f32.gmra.mrb[12].mxu0 %v3714_v23  ;;  %1752 = vmatprep.mubr.f32.mxu1 %v4155_v59 }
  0xf3   : > { %1487 = vmatprep.mubr.f32.mxu0 %v3810_v32  ;;  %2685 = vmatpush1.bf16.msra.mxu0 %v5332_v1  ;;  %v5359_v1 = vld [vmem:[#allocation31_spill] sm:$0xff] }
  0xf4   : > { %2686 = vmatprep.subr.bf16.mxu0 %v5292_v33  ;;  %2740 = vmatpush3.bf16.msra.mxu1 %v2737_v10  ;;  %v5354_v10 = vld [vmem:[#allocation34_spill] sm:$0xff] }
  0xf5   : > { %1753 = vmatmul.mubr.f32.gmra.mrb[78].mxu1 %v5333_v52  ;;  %2742 = vmatprep.subr.bf16.mxu1 %v2741_v27  ;;  %v5361_v52 = vld [vmem:[#allocation62_spill] sm:$0xff] }
  0xf6   : > { %1488 = vmatmul.mubr.f32.gmra.mrb[14].mxu0 %v5334_v35  ;;  %1757 = vmatprep.mubr.f32.mxu1 %v5335_v7 }
  0xf7   : > { %1492 = vmatprep.mubr.f32.mxu0 %v5336_v51  ;;  %2688 = vmatpush1.bf16.msra.mxu0 %v5337_v50  ;;  %v5362_v50 = vld [vmem:[#allocation39_spill] sm:$0xff] }
  0xf8   : > { %2689 = vmatprep.subr.bf16.mxu0 %v5292_v33  ;;  %2744 = vmatpush3.bf16.msra.mxu1 %v2741_v27  ;;  %v5358_v27 = vld [vmem:[#allocation36_spill] sm:$0xff] }
  0xf9   : > { %2378 = vmatmul.mubr.msk.f32.gmra.mrb[80].mxu1 %vm414_vm0, %v5338_v22  ;;  %v5363_v22 = vld [vmem:[#allocation33_spill] sm:$0xff] }
  0xfa   : > { %1493 = vmatmul.mubr.f32.gmra.mrb[16].mxu0 %v5339_v54  ;;  %1762 = vmatprep.mubr.f32.mxu1 %v5340_v45 }
  0xfb   : > { %1497 = vmatprep.mubr.f32.mxu0 %v5341_v25  ;;  %2691 = vmatpush1.bf16.msra.mxu0 %v5342_v21  ;;  %v5365_v21 = vld [vmem:[#allocation41_spill] sm:$0xff] }
  0xfc   : > { %2692 = vmatprep.subr.bf16.mxu0 %v5292_v33 }
  0xfd   : > { %1763 = vmatmul.mubr.f32.gmra.mrb[82].mxu1 %v5343_v34  ;;  %v5366_v34 = vld [vmem:[#allocation35_spill] sm:$0xff] }
  0xfe   : > { %1498 = vmatmul.mubr.f32.gmra.mrb[18].mxu0 %v5344_v13  ;;  %1767 = vmatprep.mubr.f32.mxu1 %v5345_v38 }
  0xff   : > { %1502 = vmatprep.mubr.f32.mxu0 %v5346_v53  ;;  %2694 = vmatpush1.bf16.msra.mxu0 %v5347_v29  ;;  %v284_v29 = vld [vmem:[%s3235_s9 + $0x190] sm:$0x3]  ;;  %s4846_s9 = sand.u32 1, %s3050_s19  }
 0x100   : > { %2695 = vmatprep.subr.bf16.mxu0 %v5292_v33  ;;  %s2334_s23 = sshll.u32 %s4846_s9, 8  ;;  %s2205_s10 = scalar_lea.sflag [#allocation3], %s4846_s9 }
 0x101   : > { %2379 = vmatmul.mubr.msk.f32.gmra.mrb[84].mxu1 %vm414_vm0, %v5348_v20  ;;  %v5368_v20 = vld [vmem:[#allocation43_spill] sm:$0xff]  ;;  %s4865_s25 = scalar_lea.vmem [#allocation2], %s2334_s23 }
 0x102   : > { %1503 = vmatmul.mubr.f32.gmra.mrb[20].mxu0 %v3890_v5  ;;  %1772 = vmatprep.mubr.f32.mxu1 %v5349_v42  ;;  %v5356_v5 = vld [vmem:[#allocation50_spill] sm:$0xff]  ;;  %s2223_s30 = sshll.u32 %s4865_s25, 4  ;;  %s5022_s30 = int_to_ptr.vmem [resolvable:$true] %s2223_s30 }
 0x103   : > { %1507 = vmatprep.mubr.f32.mxu0 %v5350_v36  ;;  %2697 = vmatpush1.bf16.msra.mxu0 %v5351_v47  ;;  %s2964_s11 = scalar_lea.vmem %s5022_s30, 4096  ;;  %p2971_p0 = scmp.lt.s32.totalorder %s5022_s30, %s2969_s13 }
 0x104   : > { %2698 = vmatprep.subr.bf16.mxu0 %v5292_v33  ;;  %p2965_p11 = scmp.ne.s32.totalorder %s5022_s30, %s2964_s11  ;;  %p2972_p1 = scmp.lt.s32.totalorder %s2970_s15, %s2964_s11 }
 0x105   : > { %1773 = vmatmul.mubr.f32.gmra.mrb[86].mxu1 %v5352_v17 }
 0x106   : > { %1508 = vmatmul.mubr.f32.gmra.mrb[22].mxu0 %v3937_v58  ;;  %1777 = vmatprep.mubr.f32.mxu1 %v5353_v6  ;;  %v5360_v58 = vld [vmem:[#allocation51_spill] sm:$0xff]  ;;  %p2966_p12 = pnand %p2965_p11, %p3134_p5  ;;  %p2973_p2 = por %p2972_p1, %p2971_p0 }
 0x107   : > { %1512 = vmatprep.mubr.f32.mxu0 %v5354_v10  ;;  %2700 = vmatpush1.bf16.msra.mxu0 %v5355_v28 }
 0x108   : > { %2701 = vmatprep.subr.bf16.mxu0 %v5292_v33  ;;  %p2967_p13 = pneg %p2966_p12 }
 0x109   : > { %2380 = vmatmul.mubr.msk.f32.gmra.mrb[88].mxu1 %vm414_vm0, %v5356_v5  ;;  %v5374_v5 = vld [vmem:[#allocation54_spill] sm:$0xff] }
 0x10a   : > { %1513 = vmatmul.mubr.f32.gmra.mrb[24].mxu0 %v3987_v19  ;;  %1782 = vmatprep.mubr.f32.mxu1 %v5357_v26  ;;  %v5364_v19 = vld [vmem:[#allocation64_spill] sm:$0xff]  ;;  %p2974_p3 = pnand %p2973_p2, %p2967_p13 }
 0x10b   : > { %1517 = vmatprep.mubr.f32.mxu0 %v5358_v27  ;;  %2703 = vmatpush1.bf16.msra.mxu0 %v5359_v1  ;;  %v5376_v1 = vld [vmem:[#allocation8_spill] sm:$0xff] }
 0x10c   : > { %2704 = vmatprep.subr.bf16.mxu0 %v5292_v33 }
 0x10d   : > { %1783 = vmatmul.mubr.f32.gmra.mrb[90].mxu1 %v5360_v58  ;;  %v5377_v58 = vld [vmem:[#allocation59_spill] sm:$0xff] }
 0x10e   : > { %1518 = vmatmul.mubr.f32.gmra.mrb[26].mxu0 %v4023_v18  ;;  %1787 = vmatprep.mubr.f32.mxu1 %v5361_v52  ;;  %v5367_v18 = vld [vmem:[#allocation58_spill] sm:$0xff] }
 0x10f   : > { %1522 = vmatprep.mubr.f32.mxu0 %v5362_v50  ;;  %2706 = vmatpush1.bf16.msra.mxu0 %v5363_v22 }
 0x110   : > { %2707 = vmatprep.subr.bf16.mxu0 %v5292_v33 }
 0x111   : > { %2381 = vmatmul.mubr.msk.f32.gmra.mrb[92].mxu1 %vm414_vm0, %v4256_v4  ;;  %v5369_v4 = vld [vmem:[#allocation38_spill] sm:$0xff] }
 0x112   : > { %1523 = vmatmul.mubr.f32.gmra.mrb[28].mxu0 %v4056_v24  ;;  %1792 = vmatprep.mubr.f32.mxu1 %v5364_v19  ;;  %v345_v24 = vmul.f32 %v4104_v61, %v284_v29  ;;  %v5371_v61 = vld [vmem:[#allocation48_spill] sm:$0xff]  ;;  %v5380_v29 = vld [vmem:[#allocation63_spill] sm:$0xff] }
 0x113   : > { %1527 = vmatprep.mubr.f32.mxu0 %v5365_v21  ;;  %2709 = vmatpush1.bf16.msra.mxu0 %v5366_v34  ;;  %v5379_v34 = vld [vmem:[#allocation61_spill] sm:$0xff] }
 0x114   : > { %2710 = vmatprep.subr.bf16.mxu0 %v5292_v33  ;;  %v5370_v33 = vld [vmem:[#allocation45_spill] sm:$0xff]  ;;  %v406_v47 = vadd.f32 %v4121_v44, %v345_v24  ;;  %v5373_v44 = vld [vmem:[#allocation52_spill] sm:$0xff] }
 0x115   : > { %1793 = vmatmul.mubr.f32.gmra.mrb[94].mxu1 %v5367_v18  ;;  %v5381_v24 = vld [vmem:[#allocation65_spill] sm:$0xff] }
 0x116   : > { %1528 = vmatmul.mubr.f32.gmra.mrb[30].mxu0 %v4098_v11  ;;  %1797 = vmatprep.mubr.f32.mxu1 %v4352_v8  ;;  %v4589_v11 = vsel %vm414_vm0, %v4385_v62, 0.0  ;;  %v4600_v28 = vsel %vm425_vm1, %v406_v47, 0.0 }
 0x117   : > { %1532 = vmatprep.mubr.f32.mxu0 %v5368_v20  ;;  %2712 = vmatpush1.bf16.msra.mxu0 %v5369_v4 }
 0x119   : > { %2382 = vmatmul.mubr.msk.f32.gmra.mrb[96].mxu1 %vm414_vm0, %v4298_v9  ;;  %v764_v9 = vrot.slane %v4409_v48, 1 }
 0x11a   : > { %1533 = vmatmul.mubr.f32.gmra.mrb[32].mxu0 %v4132_v41  ;;  %1802 = vmatprep.mubr.f32.mxu1 %v4373_v46  ;;  %v763_v41 = vrot.slane %v4589_v11, 1 }
 0x11b   : > { %1537 = vmatprep.mubr.f32.mxu0 %v5370_v33 }
 0x11d   : > { %1803 = vmatmul.mubr.f32.gmra.mrb[98].mxu1 %v4304_v60  ;;  %v766_v60 = vrot.slane %v4600_v28, 1 }
 0x11e   : > { %1538 = vmatmul.mubr.f32.gmra.mrb[34].mxu0 %v4155_v59  ;;  %1807 = vmatprep.mubr.f32.mxu1 %v4393_v31  ;;  %v4609_v59 = vsel %vm534_vm2, %v763_v41, %v764_v9 }
 0x11f   : > { %1542 = vmatprep.mubr.f32.mxu0 %v5371_v61 }
 0x121   : > { %2383 = vmatmul.mubr.msk.f32.gmra.mrb[100].mxu1 %vm414_vm0, %v4344_v15  ;;  %v4617_v15 = vsel %vm534_vm2, %v764_v9, %v766_v60  ;;  %v5385_v9 = vld [vmem:[#allocation14_spill] sm:$0xff]  ;;  %v5390_v60 = vld [vmem:[#allocation19_spill] sm:$0xff] }
 0x122   : > { %1543 = vmatmul.mubr.f32.gmra.mrb[36].mxu0 %v5335_v7  ;;  %1812 = vmatprep.mubr.f32.mxu1 %v4406_v49  ;;  %v5375_v7 = vld [vmem:[#allocation56_spill] sm:$0xff] }
 0x123   : > { %1547 = vmatprep.mubr.f32.mxu0 %v5373_v44 }
 0x125   : > { %1813 = vmatmul.mubr.f32.gmra.mrb[102].mxu1 %v4355_v14 }
 0x126   : > { %1548 = vmatmul.mubr.f32.gmra.mrb[38].mxu0 %v5340_v45  ;;  %1817 = vmatprep.mubr.f32.mxu1 %v4609_v59 }
 0x127   : > { %1552 = vmatprep.mubr.f32.mxu0 %v5374_v5 }
 0x129   : > { %2384 = vmatmul.mubr.msk.f32.gmra.mrb[104].mxu1 %vm414_vm0, %v4385_v62  ;;  %v5378_v62 = vmov 0.0  }
 0x12a   : > { %1553 = vmatmul.mubr.f32.gmra.mrb[40].mxu0 %v5345_v38  ;;  %1822 = vmatprep.mubr.f32.mxu1 %v4617_v15 }
 0x12b   : > { %1557 = vmatprep.mubr.f32.mxu0 %v5375_v7 }
 0x12c   : > { %v4625_v14 = vpop.f32.mrb[0].mxu1 }
 0x12d   : > { %1823 = vmatmul.mubr.f32.gmra.mrb[106].mxu1 %v4409_v48  ;;  %v1006_v45 = vpop.f32.mrb[1].mxu1 }
 0x12e   : > { %1558 = vmatmul.mubr.f32.gmra.mrb[42].mxu0 %v5349_v42  ;;  %1827 = vmatprep.mubr.f32.mxu1 %v5376_v1 }
 0x12f   : > { %1562 = vmatprep.mubr.f32.mxu0 %v5377_v58 }
 0x130   : > { %v4631_v22 = vpop.f32.mrb[2].mxu1 }
 0x131   : > { %1828 = vmatmul.mubr.f32.gmra.mrb[108].mxu1 %v5378_v62  ;;  %v1011_v38 = vpop.f32.mrb[3].mxu1 }
 0x132   : > { %1563 = vmatmul.mubr.f32.gmra.mrb[44].mxu0 %v5353_v6  ;;  %1832 = vmatprep.mubr.f32.mxu1 %v5376_v1 }
 0x133   : > { %1567 = vmatprep.mubr.f32.mxu0 %v5379_v34 }
 0x134   : > { %v4637_v18 = vpop.f32.mrb[4].mxu1 }
 0x135   : > { %1833 = vmatmul.mubr.f32.gmra.mrb[110].mxu1 %v5378_v62  ;;  %v1016_v42 = vpop.f32.mrb[5].mxu1 }
 0x136   : > { %1568 = vmatmul.mubr.f32.gmra.mrb[46].mxu0 %v5357_v26  ;;  %2473 = vmatprep.mubr.f32.mxu1 %v3585_v12 }
 0x137   : > { %1572 = vmatprep.mubr.f32.mxu0 %v5380_v29 }
 0x138   : > { %v4643_v4 = vpop.f32.mrb[6].mxu1 }
 0x139   : > { %2474 = vmatmul.mubr.f32.vlgmr.msra.gmra.mrb[112].mxu1 %v3640_v37  ;;  %v1021_v6 = vpop.f32.mrb[7].mxu1 }
 0x13a   : > { %1573 = vmatmul.mubr.f32.gmra.mrb[48].mxu0 %v5361_v52  ;;  %2476 = vmatprep.mubr.f32.mxu1 %v3677_v0 }
 0x13b   : > { %1577 = vmatprep.mubr.f32.mxu0 %v5381_v24 }
 0x13c   : > { %v4649_v47 = vpop.f32.mrb[8].mxu1 }
 0x13d   : > { %2477 = vmatmul.mubr.f32.gmra.mrb[114].mxu1 %v3724_v30  ;;  %v1026_v26 = vpop.f32.mrb[9].mxu1 }
 0x13e   : > { %1578 = vmatmul.mubr.f32.gmra.mrb[50].mxu0 %v5364_v19  ;;  %2479 = vmatprep.mubr.f32.mxu1 %v3763_v63  ;;  %v770_v63 = vrot.slane %v4589_v11, 2  ;;  %v5382_v19 = vld [vmem:[#allocation11_spill] sm:$0xff] }
 0x13f   : > { %1582 = vmatprep.mubr.f32.mxu0 %v4366_v3 }
 0x140   : > { %v4655_v12 = vpop.f32.mrb[10].mxu1 }
 0x141   : > { %2480 = vmatmul.mubr.f32.gmra.mrb[116].mxu1 %v3810_v32  ;;  %v1031_v37 = vpop.f32.mrb[11].mxu1  ;;  %v771_v32 = vrot.slane %v4409_v48, 2 }
 0x142   : > { %1583 = vmatmul.mubr.f32.gmra.mrb[52].mxu0 %v4352_v8  ;;  %2482 = vmatprep.mubr.f32.mxu1 %v5336_v51 }
 0x143   : > { %1587 = vmatprep.mubr.f32.mxu0 %v4390_v43 }
 0x144   : > { %v4661_v0 = vpop.f32.mrb[12].mxu1 }
 0x145   : > { %2483 = vmatmul.mubr.f32.gmra.mrb[118].mxu1 %v5341_v25  ;;  %v1036_v30 = vpop.f32.mrb[13].mxu1  ;;  %v773_v25 = vrot.slane %v4600_v28, 2  ;;  %v5386_v28 = vld [vmem:[#allocation15_spill] sm:$0xff] }
 0x146   : > { %1588 = vmatmul.mubr.f32.gmra.mrb[54].mxu0 %v4373_v46  ;;  %2485 = vmatprep.mubr.f32.mxu1 %v5346_v53  ;;  %v772_v46 = vsel %vm647_vm3, %v770_v63, %v771_v32 }
 0x147   : > { %1592 = vmatprep.mubr.f32.mxu0 %v4403_v55 }
 0x148   : > { %v4669_v8 = vpop.f32.mrb[14].mxu1 }
 0x149   : > { %2486 = vmatmul.mubr.f32.gmra.mrb[120].mxu1 %v5350_v36  ;;  %v1041_v51 = vpop.f32.mrb[15].mxu1 }
 0x14a   : > { %1593 = vmatmul.mubr.f32.gmra.mrb[56].mxu0 %v4393_v31  ;;  %2488 = vmatprep.mubr.f32.mxu1 %v5354_v10  ;;  %v774_v31 = vsel %vm647_vm3, %v771_v32, %v773_v25 }
 0x14b   : > { %1597 = vmatprep.mubr.f32.mxu0 %v4418_v57 }
 0x14c   : > { %v4677_v53 = vpop.f32.mrb[16].mxu1 }
 0x14d   : > { %2489 = vmatmul.mubr.f32.gmra.mrb[122].mxu1 %v5358_v27  ;;  %v1046_v48 = vpop.f32.mrb[17].mxu1 }
 0x14e   : > { %1598 = vmatmul.mubr.f32.gmra.mrb[58].mxu0 %v4406_v49  ;;  %2491 = vmatprep.mubr.f32.mxu1 %v5362_v50 }
 0x14f   : > { %1602 = vmatprep.mubr.f32.mxu0 %v772_v46 }
 0x150   : > { %v4683_v36 = vpop.f32.mrb[18].mxu1 }
 0x151   : > { %2492 = vmatmul.mubr.f32.gmra.mrb[124].mxu1 %v5365_v21  ;;  %v1051_v10 = vpop.f32.mrb[19].mxu1 }
 0x152   : > { %1603 = vmatmul.mubr.f32.gmra.mrb[60].mxu0 %v4609_v59  ;;  %2494 = vmatprep.mubr.f32.mxu1 %v5368_v20  ;;  %v5388_v59 = vld [vmem:[#allocation18_spill] sm:$0xff] }
 0x153   : > { %1607 = vmatprep.mubr.f32.mxu0 %v774_v31 }
 0x154   : > { %v4688_v52 = vpop.f32.mrb[20].mxu1 }
 0x155   : > { %2495 = vmatmul.mubr.f32.gmra.mrb[126].mxu1 %v5370_v33  ;;  %v1056_v49 = vpop.f32.mrb[21].mxu1  ;;  %v5383_v33 = vld [vmem:[#allocation12_spill] sm:$0xff] }
 0x156   : > { %1608 = vmatmul.mubr.f32.gmra.mrb[62].mxu0 %v4617_v15  ;;  %2497 = vmatprep.mubr.f32.mxu1 %v5371_v61  ;;  %v5384_v61 = vld [vmem:[#allocation13_spill] sm:$0xff] }
 0x157   : > { %1677 = vmatprep.mubr.f32.mxu0 %v3546_v56 }
 0x158   : > { %v4694_v27 = vpop.f32.mrb[22].mxu1 }
 0x159   : > { %2498 = vmatmul.mubr.f32.gmra.mrb[128].mxu1 %v5373_v44  ;;  %v1061_v50 = vpop.f32.mrb[23].mxu1  ;;  %v5387_v44 = vld [vmem:[#allocation16_spill] sm:$0xff] }
 0x15a   : > { %2370 = vmatmul.mubr.msk.f32.vlgmr.msra.gmra.mrb[0].mxu0 %vm414_vm0, %v5382_v19  ;;  %2500 = vmatprep.mubr.f32.mxu1 %v5374_v5 }
 0x15b   : > { %1682 = vmatprep.mubr.f32.mxu0 %v3593_v16 }
 0x15c   : > { %v4702_v21 = vpop.f32.mrb[24].mxu1 }
 0x15d   : > { %2501 = vmatmul.mubr.f32.gmra.mrb[130].mxu1 %v5375_v7  ;;  %v1066_v20 = vpop.f32.mrb[25].mxu1 }
 0x15e   : > { %1683 = vmatmul.mubr.f32.gmra.mrb[2].mxu0 %v5383_v33  ;;  %2503 = vmatprep.mubr.f32.mxu1 %v5377_v58 }
 0x15f   : > { %1687 = vmatprep.mubr.f32.mxu0 %v3643_v40 }
 0x160   : > { %v4708_v56 = vpop.f32.mrb[26].mxu1 }
 0x161   : > { %2504 = vmatmul.mubr.f32.gmra.mrb[132].mxu1 %v5379_v34  ;;  %v1071_v11 = vpop.f32.mrb[27].mxu1 }
 0x162   : > { %2371 = vmatmul.mubr.msk.f32.gmra.mrb[4].mxu0 %vm414_vm0, %v5384_v61  ;;  %2506 = vmatprep.mubr.f32.mxu1 %v5380_v29 }
 0x163   : > { %1692 = vmatprep.mubr.f32.mxu0 %v3680_v2 }
 0x164   : > { %v4716_v16 = vpop.f32.mrb[28].mxu1 }
 0x165   : > { %2507 = vmatmul.mubr.f32.gmra.mrb[134].mxu1 %v5381_v24  ;;  %v1076_v41 = vpop.f32.mrb[29].mxu1 }
 0x166   : > { %1693 = vmatmul.mubr.f32.gmra.mrb[6].mxu0 %v5385_v9  ;;  %2509 = vmatprep.mubr.f32.mxu1 %v4366_v3 }
 0x167   : > { %1697 = vmatprep.mubr.f32.mxu0 %v3714_v23 }
 0x168   : > { %v4722_v40 = vpop.f32.mrb[30].mxu1 }
 0x169   : > { %2510 = vmatmul.mubr.f32.gmra.mrb[136].mxu1 %v4390_v43  ;;  %v1081_v17 = vpop.f32.mrb[31].mxu1 }
 0x16a   : > { %2372 = vmatmul.mubr.msk.f32.gmra.mrb[8].mxu0 %vm414_vm0, %v5386_v28  ;;  %2512 = vmatprep.mubr.f32.mxu1 %v4403_v55  ;;  %v5389_v55 = vld [vmem:[#allocation10_spill] sm:$0xff] }
 0x16b   : > { %1702 = vmatprep.mubr.f32.mxu0 %v5334_v35 }
 0x16c   : > { %v4730_v2 = vpop.f32.mrb[32].mxu1 }
 0x16d   : > { %2513 = vmatmul.mubr.f32.gmra.mrb[138].mxu1 %v4418_v57  ;;  %v1086_v3 = vpop.f32.mrb[33].mxu1 }
 0x16e   : > { %1703 = vmatmul.mubr.f32.gmra.mrb[10].mxu0 %v5387_v44  ;;  %2515 = vmatprep.mubr.f32.mxu1 %v772_v46 }
 0x16f   : > { %1707 = vmatprep.mubr.f32.mxu0 %v5339_v54 }
 0x170   : > { %v4735_v23 = vpop.f32.mrb[34].mxu1 }
 0x171   : > { %2516 = vmatmul.mubr.f32.gmra.mrb[140].mxu1 %v774_v31  ;;  %v1091_v43 = vpop.f32.mrb[35].mxu1 }
 0x172   : > { %2373 = vmatmul.mubr.msk.f32.gmra.mrb[12].mxu0 %vm414_vm0, %v5388_v59  ;;  %2518 = vmatprep.mubr.f32.mxu1 %v5389_v55 }
 0x173   : > { %1712 = vmatprep.mubr.f32.mxu0 %v5344_v13 }
 0x174   : > { %v4742_v35 = vpop.f32.mrb[36].mxu1 }
 0x175   : > { %2519 = vmatmul.mubr.f32.gmra.mrb[142].mxu1 %v5389_v55  ;;  %v1096_v57 = vpop.f32.mrb[37].mxu1 }
 0x176   : > { %1713 = vmatmul.mubr.f32.gmra.mrb[14].mxu0 %v5390_v60 }
 0x178   : > { %v4746_v54 = vpop.f32.mrb[38].mxu1 }
 0x179   : > { %v1101_v5 = vpop.f32.mrb[39].mxu1 }
 0x17c   : > { %v4748_v15 = vpop.f32.mrb[40].mxu1 }
 0x17d   : > { %v1106_v7 = vpop.f32.mrb[41].mxu1 }
 0x180   : > { %v4750_v45 = vpop.f32.mrb[42].mxu1 }
 0x181   : > { %v1111_v39 = vpop.f32.mrb[43].mxu1 }
 0x184   : > { %v4752_v1 = vpop.f32.mrb[44].mxu1 }
 0x185   : > { %v1116_v58 = vpop.f32.mrb[45].mxu1 }
 0x188   : > { %v4754_v13 = vpop.f32.mrb[46].mxu1 }
 0x189   : > { %v1121_v62 = vpop.f32.mrb[47].mxu1 }
 0x18c   : > { %v4756_v38 = vpop.f32.mrb[48].mxu1 }
 0x18d   : > { %v1126_v34 = vpop.f32.mrb[49].mxu1 }
 0x190   : > { %v4758_v42 = vpop.f32.mrb[50].mxu1 }
 0x191   : > { %v1131_v29 = vpop.f32.mrb[51].mxu1 }
 0x194   : > { %v4760_v6 = vpop.f32.mrb[52].mxu1 }
 0x195   : > { %v1136_v24 = vpop.f32.mrb[53].mxu1 }
 0x198   : > { %v4762_v26 = vpop.f32.mrb[54].mxu1 }
 0x199   : > { %v1141_v37 = vpop.f32.mrb[55].mxu1 }
 0x19c   : > { %v4764_v30 = vpop.f32.mrb[56].mxu1 }
 0x19d   : > { %v1146_v63 = vpop.f32.mrb[57].mxu1 }
 0x1a0   : > { %v4766_v32 = vpop.f32.mrb[58].mxu1 }
 0x1a1   : > { %v1151_v51 = vpop.f32.mrb[59].mxu1 }
 0x1a4   : > { %v4768_v46 = vpop.f32.mrb[60].mxu1 }
 0x1a5   : > { %v1156_v25 = vpop.f32.mrb[61].mxu1 }
 0x1a8   : > { %v4770_v48 = vpop.f32.mrb[62].mxu1 }
 0x1a9   : > { %v1161_v31 = vpop.f32.mrb[63].mxu1 }
 0x1ac   : > { %v1719_v10 = vpop.f32.mrb[64].mxu1 }
 0x1ad   : > { %v1721_v49 = vpop.f32.mrb[65].mxu1 }
 0x1b0   : > { %v1724_v50 = vpop.f32.mrb[66].mxu1 }
 0x1b1   : > { %v1726_v19 = vpop.f32.mrb[67].mxu1 }
 0x1b4   : > { %v1729_v20 = vpop.f32.mrb[68].mxu1 }
 0x1b5   : > { %v1731_v33 = vpop.f32.mrb[69].mxu1 }
 0x1b8   : > { %v1734_v11 = vpop.f32.mrb[70].mxu1 }
 0x1b9   : > { %v1736_v61 = vpop.f32.mrb[71].mxu1 }
 0x1bc   : > { %v1739_v41 = vpop.f32.mrb[72].mxu1 }
 0x1bd   : > { %v1741_v9 = vpop.f32.mrb[73].mxu1 }
 0x1c0   : > { %v1744_v17 = vpop.f32.mrb[74].mxu1 }
 0x1c1   : > { %v1746_v28 = vpop.f32.mrb[75].mxu1 }
 0x1c4   : > { %v1749_v3 = vpop.f32.mrb[76].mxu1 }
 0x1c5   : > { %v1751_v44 = vpop.f32.mrb[77].mxu1 }
 0x1c8   : > { %v1754_v43 = vpop.f32.mrb[78].mxu1 }
 0x1c9   : > { %v1756_v59 = vpop.f32.mrb[79].mxu1 }
 0x1cc   : > { %v1759_v55 = vpop.f32.mrb[80].mxu1 }
 0x1cd   : > { %v1494_v57 = vpop.f32.mrb[16].mxu0  ;;  %v1761_v60 = vpop.f32.mrb[81].mxu1 }
 0x1ce   : > { %v2785_v5 = vadd.f32 %v1494_v57, %v4677_v53  ;;  %v1496_v7 = vpop.f32.mrb[17].mxu0 }
 0x1d0   : > { %v4773_v39 = vadd.f32 %v2785_v5, %v1719_v10  ;;  %v1764_v58 = vpop.f32.mrb[82].mxu1 }
 0x1d1   : > { %v1499_v62 = vpop.f32.mrb[18].mxu0  ;;  %v1766_v34 = vpop.f32.mrb[83].mxu1 }
 0x1d2   : > { %v2787_v29 = vadd.f32 %v1499_v62, %v4683_v36  ;;  %v1501_v24 = vpop.f32.mrb[19].mxu0 }
 0x1d4   : > { %v4776_v37 = vadd.f32 %v2787_v29, %v1724_v50  ;;  %v1769_v63 = vpop.f32.mrb[84].mxu1 }
 0x1d5   : > { %v1504_v51 = vpop.f32.mrb[20].mxu0  ;;  %v1771_v25 = vpop.f32.mrb[85].mxu1 }
 0x1d6   : > { %v2789_v31 = vadd.f32 %v1504_v51, %v4688_v52  ;;  %v1506_v49 = vpop.f32.mrb[21].mxu0 }
 0x1d8   : > { %v4779_v19 = vadd.f32 %v2789_v31, %v1729_v20  ;;  %v1774_v53 = vpop.f32.mrb[86].mxu1 }
 0x1d9   : > { %v1509_v33 = vpop.f32.mrb[22].mxu0  ;;  %v1776_v10 = vpop.f32.mrb[87].mxu1 }
 0x1da   : > { %v2791_v61 = vadd.f32 %v1509_v33, %v4694_v27  ;;  %v1511_v9 = vpop.f32.mrb[23].mxu0 }
 0x1dc   : > { %v4782_v28 = vadd.f32 %v2791_v61, %v1734_v11  ;;  %v1779_v36 = vpop.f32.mrb[88].mxu1 }
 0x1dd   : > { %v1514_v44 = vpop.f32.mrb[24].mxu0  ;;  %v1781_v50 = vpop.f32.mrb[89].mxu1 }
 0x1de   : > { %v2793_v59 = vadd.f32 %v1514_v44, %v4702_v21  ;;  %v1516_v57 = vpop.f32.mrb[25].mxu0 }
 0x1e0   : > { %v4785_v60 = vadd.f32 %v2793_v59, %v1739_v41  ;;  %v1784_v52 = vpop.f32.mrb[90].mxu1 }
 0x1e1   : > { %v1519_v5 = vpop.f32.mrb[26].mxu0  ;;  %v1786_v20 = vpop.f32.mrb[91].mxu1 }
 0x1e2   : > { %v2795_v7 = vadd.f32 %v1519_v5, %v4708_v56  ;;  %v1521_v62 = vpop.f32.mrb[27].mxu0 }
 0x1e4   : > { %v4788_v34 = vadd.f32 %v2795_v7, %v1744_v17  ;;  %v1789_v27 = vpop.f32.mrb[92].mxu1 }
 0x1e5   : > { %v1524_v29 = vpop.f32.mrb[28].mxu0  ;;  %v1791_v11 = vpop.f32.mrb[93].mxu1 }
 0x1e6   : > { %v2797_v24 = vadd.f32 %v1524_v29, %v4716_v16  ;;  %v1526_v51 = vpop.f32.mrb[29].mxu0 }
 0x1e8   : > { %v4791_v25 = vadd.f32 %v2797_v24, %v1749_v3  ;;  %v1794_v21 = vpop.f32.mrb[94].mxu1 }
 0x1e9   : > { %v1529_v31 = vpop.f32.mrb[30].mxu0  ;;  %v1796_v41 = vpop.f32.mrb[95].mxu1 }
 0x1ea   : > { %v2799_v49 = vadd.f32 %v1529_v31, %v4722_v40  ;;  %v1531_v33 = vpop.f32.mrb[31].mxu0 }
 0x1ec   : > { %v4794_v10 = vadd.f32 %v2799_v49, %v1754_v43  ;;  %v1799_v56 = vpop.f32.mrb[96].mxu1 }
 0x1ed   : > { %v1534_v61 = vpop.f32.mrb[32].mxu0  ;;  %v1801_v17 = vpop.f32.mrb[97].mxu1 }
 0x1ee   : > { %v2801_v9 = vadd.f32 %v1534_v61, %v4730_v2  ;;  %v1536_v44 = vpop.f32.mrb[33].mxu0 }
 0x1f0   : > { %v4797_v50 = vadd.f32 %v2801_v9, %v1759_v55  ;;  %v1804_v16 = vpop.f32.mrb[98].mxu1 }
 0x1f1   : > { %v1539_v59 = vpop.f32.mrb[34].mxu0  ;;  %v1806_v3 = vpop.f32.mrb[99].mxu1 }
 0x1f2   : > { %v2803_v57 = vadd.f32 %v1539_v59, %v4735_v23  ;;  %v1541_v5 = vpop.f32.mrb[35].mxu0 }
 0x1f4   : > { %v4800_v20 = vadd.f32 %v2803_v57, %v1764_v58  ;;  %v1809_v40 = vpop.f32.mrb[100].mxu1 }
 0x1f5   : > { %v1544_v7 = vpop.f32.mrb[36].mxu0  ;;  %v1811_v43 = vpop.f32.mrb[101].mxu1 }
 0x1f6   : > { %v2805_v62 = vadd.f32 %v1544_v7, %v4742_v35  ;;  %v1546_v29 = vpop.f32.mrb[37].mxu0 }
 0x1f8   : > { %v4803_v11 = vadd.f32 %v2805_v62, %v1769_v63  ;;  %v1814_v2 = vpop.f32.mrb[102].mxu1 }
 0x1f9   : > { %v1549_v24 = vpop.f32.mrb[38].mxu0  ;;  %v1816_v55 = vpop.f32.mrb[103].mxu1 }
 0x1fa   : > { %v2807_v51 = vadd.f32 %v1549_v24, %v4746_v54  ;;  %v1551_v31 = vpop.f32.mrb[39].mxu0 }
 0x1fc   : > { %v4806_v41 = vadd.f32 %v2807_v51, %v1774_v53  ;;  %v1819_v23 = vpop.f32.mrb[104].mxu1 }
 0x1fd   : > { %v1554_v49 = vpop.f32.mrb[40].mxu0  ;;  %v1821_v58 = vpop.f32.mrb[105].mxu1 }
 0x1fe   : > { %v2809_v33 = vadd.f32 %v1554_v49, %v4748_v15  ;;  %v1556_v61 = vpop.f32.mrb[41].mxu0 }
 0x200   : > { %v4809_v17 = vadd.f32 %v2809_v33, %v1779_v36  ;;  %v4811_v35 = vpop.f32.mrb[106].mxu1 }
 0x201   : > { %v1559_v63 = vpop.f32.mrb[42].mxu0  ;;  %v1826_v9 = vpop.f32.mrb[107].mxu1 }
 0x202   : > { %v2811_v44 = vadd.f32 %v1559_v63, %v4750_v45  ;;  %v1561_v59 = vpop.f32.mrb[43].mxu0 }
 0x204   : > { %v4814_v3 = vpop.f32.mrb[108].mxu1  ;;  %v4816_v54 = vadd.f32 %v2811_v44, %v1784_v52 }
 0x205   : > { %v1564_v53 = vpop.f32.mrb[44].mxu0  ;;  %v1831_v57 = vpop.f32.mrb[109].mxu1 }
 0x206   : > { %v2813_v5 = vadd.f32 %v1564_v53, %v4752_v1  ;;  %v1566_v7 = vpop.f32.mrb[45].mxu0 }
 0x208   : > { %v4819_v15 = vpop.f32.mrb[110].mxu1  ;;  %v4821_v36 = vadd.f32 %v2813_v5, %v1789_v27 }
 0x209   : > { %v1569_v43 = vpop.f32.mrb[46].mxu0  ;;  %v1836_v62 = vpop.f32.mrb[111].mxu1 }
 0x20a   : > { %v2815_v29 = vadd.f32 %v1569_v43, %v4754_v13  ;;  %v1571_v24 = vpop.f32.mrb[47].mxu0 }
 0x20c   : > { %v4824_v45 = vpop.f32.mrb[112].mxu1  ;;  %v4826_v55 = vadd.f32 %v2815_v29, %v1794_v21 }
 0x20d   : > { %v1574_v52 = vpop.f32.mrb[48].mxu0  ;;  %v4828_v51 = vpop.f32.mrb[113].mxu1 }
 0x20e   : > { %v2817_v1 = vadd.f32 %v1574_v52, %v4756_v38  ;;  %v1576_v31 = vpop.f32.mrb[49].mxu0 }
 0x210   : > { %v4831_v49 = vpop.f32.mrb[114].mxu1  ;;  %v4833_v27 = vadd.f32 %v2817_v1, %v1799_v56 }
 0x211   : > { %v1579_v58 = vpop.f32.mrb[50].mxu0  ;;  %v4835_v33 = vpop.f32.mrb[115].mxu1 }
 0x212   : > { %v2819_v13 = vadd.f32 %v1579_v58, %v4758_v42  ;;  %v1581_v61 = vpop.f32.mrb[51].mxu0 }
 0x214   : > { %v4838_v63 = vpop.f32.mrb[116].mxu1  ;;  %v4840_v21 = vadd.f32 %v2819_v13, %v1804_v16 }
 0x215   : > { %v1584_v9 = vpop.f32.mrb[52].mxu0  ;;  %v4842_v44 = vpop.f32.mrb[117].mxu1 }
 0x216   : > { %v2821_v38 = vadd.f32 %v1584_v9, %v4760_v6  ;;  %v1586_v59 = vpop.f32.mrb[53].mxu0 }
 0x218   : > { %v4848_v56 = vpop.f32.mrb[118].mxu1  ;;  %v4850_v53 = vadd.f32 %v2821_v38, %v1809_v40 }
 0x219   : > { %v1589_v57 = vpop.f32.mrb[54].mxu0  ;;  %v4852_v42 = vpop.f32.mrb[119].mxu1 }
 0x21a   : > { %v2823_v16 = vadd.f32 %v1589_v57, %v4762_v26  ;;  %v1591_v5 = vpop.f32.mrb[55].mxu0 }
 0x21c   : > { %v2487_v7 = vpop.f32.mrb[120].mxu1  ;;  %v4856_v43 = vadd.f32 %v2823_v16, %v1814_v2 }
 0x21d   : > { %v1594_v62 = vpop.f32.mrb[56].mxu0  ;;  %v4859_v6 = vadd.f32 %v4776_v37, %v2487_v7  ;;  %v1944_v29 = vpop.f32.mrb[121].mxu1 }
 0x21e   : > { %v2825_v24 = vadd.f32 %v1594_v62, %v4764_v30  ;;  %v1596_v52 = vpop.f32.mrb[57].mxu0  ;;  %v4863_v40 = vadd.f32 %v4773_v39, %v1944_v29 }
 0x21f   : > { %2072 = vst [vmem:[%s4865_s25 + $0x48] sm:$0xff] %v4859_v6 }
 0x220   : > { %2071 = vst [vmem:[%s4865_s25 + $0x40] sm:$0xff] %v4863_v40  ;;  %v2490_v26 = vpop.f32.mrb[122].mxu1  ;;  %v4871_v37 = vadd.f32 %v2825_v24, %v1819_v23 }
 0x221   : > { %v1599_v2 = vpop.f32.mrb[58].mxu0  ;;  %v4874_v30 = vadd.f32 %v4782_v28, %v2490_v26  ;;  %v1954_v39 = vpop.f32.mrb[123].mxu1 }
 0x222   : > { %v2827_v1 = vadd.f32 %v1599_v2, %v4766_v32  ;;  %v1601_v31 = vpop.f32.mrb[59].mxu0  ;;  %v4878_v58 = vadd.f32 %v4779_v19, %v1954_v39 }
 0x223   : > { %2074 = vst [vmem:[%s4865_s25 + $0x58] sm:$0xff] %v4874_v30 }
 0x224   : > { %2073 = vst [vmem:[%s4865_s25 + $0x50] sm:$0xff] %v4878_v58  ;;  %v2493_v13 = vpop.f32.mrb[124].mxu1  ;;  %v4885_v23 = vadd.f32 %v2827_v1, %v4811_v35 }
 0x225   : > { %v1604_v61 = vpop.f32.mrb[60].mxu0  ;;  %v4888_v28 = vadd.f32 %v4788_v34, %v2493_v13  ;;  %v1964_v9 = vpop.f32.mrb[125].mxu1 }
 0x226   : > { %v2829_v32 = vadd.f32 %v1604_v61, %v4768_v46  ;;  %v1606_v38 = vpop.f32.mrb[61].mxu0  ;;  %v4892_v19 = vadd.f32 %v4785_v60, %v1964_v9 }
 0x227   : > { %2076 = vst [vmem:[%s4865_s25 + $0x68] sm:$0xff] %v4888_v28 }
 0x228   : > { %2075 = vst [vmem:[%s4865_s25 + $0x60] sm:$0xff] %v4892_v19  ;;  %v2496_v59 = vpop.f32.mrb[126].mxu1  ;;  %v4899_v35 = vadd.f32 %v2829_v32, %v4814_v3 }
 0x229   : > { %v1609_v57 = vpop.f32.mrb[62].mxu0  ;;  %v4902_v34 = vadd.f32 %v4794_v10, %v2496_v59  ;;  %v1974_v16 = vpop.f32.mrb[127].mxu1 }
 0x22a   : > { %v2831_v46 = vadd.f32 %v1609_v57, %v4770_v48  ;;  %v1611_v5 = vpop.f32.mrb[63].mxu0  ;;  %v4906_v60 = vadd.f32 %v4791_v25, %v1974_v16 }
 0x22b   : > { %2078 = vst [vmem:[%s4865_s25 + $0x78] sm:$0xff] %v4902_v34 }
 0x22c   : > { %2077 = vst [vmem:[%s4865_s25 + $0x70] sm:$0xff] %v4906_v60  ;;  %v2499_v3 = vpop.f32.mrb[128].mxu1  ;;  %v4913_v7 = vadd.f32 %v2831_v46, %v4819_v15 }
 0x22d   : > { %v1679_v62 = vpop.f32.mrb[0].mxu0  ;;  %v4916_v10 = vadd.f32 %v4800_v20, %v2499_v3  ;;  %v1984_v29 = vpop.f32.mrb[129].mxu1 }
 0x22e   : > { %v2777_v48 = vadd.f32 %v1679_v62, %v4625_v14  ;;  %v1681_v25 = vpop.f32.mrb[1].mxu0  ;;  %v4920_v24 = vadd.f32 %v4797_v50, %v1984_v29 }
 0x22f   : > { %2080 = vst [vmem:[%s4865_s25 + $0x88] sm:$0xff] %v4916_v10 }
 0x230   : > { %v1905_v52 = vadd.f32 %v2777_v48, %v4828_v51  ;;  %2079 = vst [vmem:[%s4865_s25 + $0x80] sm:$0xff] %v4920_v24  ;;  %v2502_v15 = vpop.f32.mrb[130].mxu1 }
 0x231   : > { %v1684_v26 = vpop.f32.mrb[2].mxu0  ;;  %v4928_v20 = vadd.f32 %v4806_v41, %v2502_v15  ;;  %v1994_v2 = vpop.f32.mrb[131].mxu1 }
 0x232   : > { %2063 = vst [vmem:[%s4865_s25] sm:$0xff] %v1905_v52  ;;  %v2778_v14 = vadd.f32 %v1684_v26, %v4631_v22  ;;  %v1686_v39 = vpop.f32.mrb[3].mxu0  ;;  %v4933_v50 = vadd.f32 %v4803_v11, %v1994_v2  ;;  %v2132_v31 = vmul.f32 %v1905_v52, %v1905_v52 }
 0x233   : > { %2082 = vst [vmem:[%s4865_s25 + $0x98] sm:$0xff] %v4928_v20 }
 0x234   : > { %v1910_v51 = vadd.f32 %v2778_v14, %v4824_v45  ;;  %2081 = vst [vmem:[%s4865_s25 + $0x90] sm:$0xff] %v4933_v50  ;;  %v2505_v1 = vpop.f32.mrb[132].mxu1 }
 0x235   : > { %v1689_v41 = vpop.f32.mrb[4].mxu0  ;;  %v4941_v13 = vadd.f32 %v4816_v54, %v2505_v1  ;;  %v2004_v22 = vpop.f32.mrb[133].mxu1 }
 0x236   : > { %2064 = vst [vmem:[%s4865_s25 + $0x8] sm:$0xff] %v1910_v51  ;;  %v2095_v61 = vadd.f32 %v1910_v51, %v1905_v52  ;;  %v2133_v9 = vmul.f32 %v1910_v51, %v1910_v51  ;;  %v2779_v11 = vadd.f32 %v1689_v41, %v4637_v18  ;;  %v1691_v32 = vpop.f32.mrb[5].mxu0  ;;  %v4946_v45 = vadd.f32 %v4809_v17, %v2004_v22 }
 0x237   : > { %2084 = vst [vmem:[%s4865_s25 + $0xa8] sm:$0xff] %v4941_v13 }
 0x238   : > { %v2164_v38 = vadd.f32 %v2133_v9, %v2132_v31  ;;  %v1915_v59 = vadd.f32 %v2779_v11, %v4835_v33  ;;  %2083 = vst [vmem:[%s4865_s25 + $0xa0] sm:$0xff] %v4946_v45  ;;  %v2508_v54 = vpop.f32.mrb[134].mxu1 }
 0x239   : > { %v1694_v57 = vpop.f32.mrb[6].mxu0  ;;  %v4954_v16 = vadd.f32 %v4826_v55, %v2508_v54  ;;  %v2014_v18 = vpop.f32.mrb[135].mxu1 }
 0x23a   : > { %2065 = vst [vmem:[%s4865_s25 + $0x10] sm:$0xff] %v1915_v59  ;;  %v2096_v46 = vadd.f32 %v2095_v61, %v1915_v59  ;;  %v2134_v5 = vmul.f32 %v1915_v59, %v1915_v59  ;;  %v2780_v17 = vadd.f32 %v1694_v57, %v4643_v4  ;;  %v1696_v3 = vpop.f32.mrb[7].mxu0  ;;  %v4959_v62 = vadd.f32 %v4821_v36, %v2014_v18 }
 0x23b   : > { %2086 = vst [vmem:[%s4865_s25 + $0xb8] sm:$0xff] %v4954_v16 }
 0x23c   : > { %v2165_v33 = vadd.f32 %v2164_v38, %v2134_v5  ;;  %v1920_v29 = vadd.f32 %v2780_v17, %v4831_v49  ;;  %2085 = vst [vmem:[%s4865_s25 + $0xb0] sm:$0xff] %v4959_v62  ;;  %v2511_v55 = vpop.f32.mrb[136].mxu1 }
 0x23d   : > { %v1699_v48 = vpop.f32.mrb[8].mxu0  ;;  %v4967_v25 = vadd.f32 %v4840_v21, %v2511_v55  ;;  %v2024_v4 = vpop.f32.mrb[137].mxu1 }
 0x23e   : > { %2066 = vst [vmem:[%s4865_s25 + $0x18] sm:$0xff] %v1920_v29  ;;  %v2097_v52 = vadd.f32 %v2096_v46, %v1920_v29  ;;  %v2135_v15 = vmul.f32 %v1920_v29, %v1920_v29  ;;  %v2781_v36 = vadd.f32 %v1699_v48, %v4649_v47  ;;  %v1701_v26 = vpop.f32.mrb[9].mxu0  ;;  %v4972_v2 = vadd.f32 %v4833_v27, %v2024_v4 }
 0x23f   : > { %2088 = vst [vmem:[%s4865_s25 + $0xc8] sm:$0xff] %v4967_v25 }
 0x240   : > { %v2166_v49 = vadd.f32 %v2165_v33, %v2135_v15  ;;  %v1925_v14 = vadd.f32 %v2781_v36, %v4842_v44  ;;  %2087 = vst [vmem:[%s4865_s25 + $0xc0] sm:$0xff] %v4972_v2  ;;  %v2514_v21 = vpop.f32.mrb[138].mxu1 }
 0x241   : > { %v1704_v39 = vpop.f32.mrb[10].mxu0  ;;  %v4980_v51 = vadd.f32 %v4856_v43, %v2514_v21  ;;  %v2034_v47 = vpop.f32.mrb[139].mxu1 }
 0x242   : > { %2067 = vst [vmem:[%s4865_s25 + $0x20] sm:$0xff] %v1925_v14  ;;  %v2098_v1 = vadd.f32 %v2097_v52, %v1925_v14  ;;  %v2136_v31 = vmul.f32 %v1925_v14, %v1925_v14  ;;  %v2782_v27 = vadd.f32 %v1704_v39, %v4655_v12  ;;  %v1706_v41 = vpop.f32.mrb[11].mxu0  ;;  %v4985_v22 = vadd.f32 %v4850_v53, %v2034_v47 }
 0x243   : > { %2090 = vst [vmem:[%s4865_s25 + $0xd8] sm:$0xff] %v4980_v51 }
 0x244   : > { %v2167_v44 = vadd.f32 %v2166_v49, %v2136_v31  ;;  %v1930_v61 = vadd.f32 %v2782_v27, %v4838_v63  ;;  %2089 = vst [vmem:[%s4865_s25 + $0xd0] sm:$0xff] %v4985_v22  ;;  %v2517_v43 = vpop.f32.mrb[140].mxu1 }
 0x245   : > { %v1709_v9 = vpop.f32.mrb[12].mxu0  ;;  %v4993_v11 = vadd.f32 %v4885_v23, %v2517_v43  ;;  %v2044_v12 = vpop.f32.mrb[141].mxu1 }
 0x246   : > { %2068 = vst [vmem:[%s4865_s25 + $0x28] sm:$0xff] %v1930_v61  ;;  %v2099_v53 = vadd.f32 %v2098_v1, %v1930_v61  ;;  %v2137_v32 = vmul.f32 %v1930_v61, %v1930_v61  ;;  %v2783_v38 = vadd.f32 %v1709_v9, %v4661_v0  ;;  %v1711_v59 = vpop.f32.mrb[13].mxu0  ;;  %v4998_v54 = vadd.f32 %v4871_v37, %v2044_v12 }
 0x247   : > { %2092 = vst [vmem:[%s4865_s25 + $0xe8] sm:$0xff] %v4993_v11 }
 0x248   : > { %v2168_v63 = vadd.f32 %v2167_v44, %v2137_v32  ;;  %v1935_v57 = vadd.f32 %v2783_v38, %v4852_v42  ;;  %2091 = vst [vmem:[%s4865_s25 + $0xe0] sm:$0xff] %v4998_v54  ;;  %v2520_v23 = vpop.f32.mrb[142].mxu1 }
 0x249   : > { %v1714_v18 = vpop.f32.mrb[14].mxu0  ;;  %v5008_v0 = vadd.f32 %v4913_v7, %v2520_v23  ;;  %v2054_v46 = vpop.f32.mrb[143].mxu1 }
 0x24a   : > { %2069 = vst [vmem:[%s4865_s25 + $0x30] sm:$0xff] %v1935_v57  ;;  %v2100_v37 = vadd.f32 %v2099_v53, %v1935_v57  ;;  %v2138_v5 = vmul.f32 %v1935_v57, %v1935_v57  ;;  %v2784_v17 = vadd.f32 %v1714_v18, %v4669_v8  ;;  %v1716_v42 = vpop.f32.mrb[15].mxu0  ;;  %v5013_v3 = vadd.f32 %v4899_v35, %v2054_v46 }
 0x24b   : > { %2094 = vst [vmem:[%s4865_s25 + $0xf8] sm:$0xff] %v5008_v0 }
 0x24c   : > { %v2169_v7 = vadd.f32 %v2168_v63, %v2138_v5  ;;  %v1940_v33 = vadd.f32 %v2784_v17, %v4848_v56  ;;  %2093 = vst [vmem:[%s4865_s25 + $0xf0] sm:$0xff] %v5013_v3 }
 0x24e   : > { %2070 = vst [vmem:[%s4865_s25 + $0x38] sm:$0xff] %v1940_v33  ;;  %v2101_v8 = vadd.f32 %v2100_v37, %v1940_v33  ;;  %v2139_v35 = vmul.f32 %v1940_v33, %v1940_v33 }
 0x24f   : > { %2977 = shalt.err (!%p2974_p3)
}
 0x250   : > { %s2978_s14 = scalar_lea.hbm %s5020_s8, 4096  ;;  %s2982_s23 = scalar_lea.hbm %s5176_s4, 8192 }
 0x251   : > { %p2979_p4 = scmp.ne.s32.totalorder %s5020_s8, %s2978_s14  ;;  %p2983_p9 = scmp.lt.u32.totalorder %s5020_s8, %s5176_s4 }
 0x252   : > { %p2984_p10 = scmp.lt.u32.totalorder %s2982_s23, %s2978_s14  ;;  %p2986_p12 = scmp.lt.u32.totalorder %s2978_s14, %s5020_s8 }
 0x253   : > { %p2980_p7 = pnand %p2979_p4, %p3134_p5 }
 0x254   : > { %p2985_p11 = por %p2984_p10, %p2983_p9 }
 0x255   : > { %p2981_p8 = pneg %p2980_p7 }
 0x256   : > { %p2987_p13 = por %p2986_p12, %p2985_p11 }
 0x258   : > { %p2988_p0 = pnand %p2987_p13, %p2981_p8 }
 0x25a   : > { %2991 = shalt.err (!%p2988_p0)
}
 0x25b   : > { %s3063_s6 = smov 128   ;;  %s3064_s7 = smov 8   ;;  %v2140_v56 = vmul.f32 %v4863_v40, %v4863_v40  ;;  %v2102_v29 = vadd.f32 %v2101_v8, %v4863_v40  ;;  %v2170_v55 = vadd.f32 %v2169_v7, %v2139_v35  ;;  %v2141_v48 = vmul.f32 %v4859_v6, %v4859_v6 }
 0x25c   : > { %2914 = dma.vmem_to_hbm [thread:$0]  (%p3134_p5), %s5022_s30, 4096, %s5020_s8, %s2205_s10, %s3063_s6, %s3063_s6, %s3064_s7   ;;  %v2142_v15 = vmul.f32 %v4878_v58, %v4878_v58  ;;  %v2143_v49 = vmul.f32 %v4874_v30, %v4874_v30  ;;  %v2144_v40 = vmul.f32 %v4892_v19, %v4892_v19  ;;  %vm2201_vm4 = vcmask 1040384  }
 0x25d   : > { %v2103_v4 = vadd.f32 %v2102_v29, %v4859_v6  ;;  %v2171_v52 = vadd.f32 %v2170_v55, %v2140_v56  ;;  %v2145_v6 = vmul.f32 %v4888_v28, %v4888_v28  ;;  %s2335_s30 = sshll.u32 %s4846_s9, 1  ;;  %s2389_s8 = sshll.u32 %s3117_s22, 5 }
 0x25e   : > { %s228_s10 = scalar_lea.vmem [#allocation4], %s2335_s30  ;;  %s5129_s15 = scalar_lea.hbm %s5177_s5, %s2389_s8 }
 0x25f   : > { %v2104_v36 = vadd.f32 %v2103_v4, %v4878_v58  ;;  %v2172_v26 = vadd.f32 %v2171_v52, %v2141_v48  ;;  %v2146_v58 = vmul.f32 %v4906_v60, %v4906_v60  ;;  %s2239_s11 = sshll.u32 %s228_s10, 4  ;;  %s2210_s14 = scalar_lea.sflag [#allocation5], %s4846_s9  ;;  %s5131_s11 = int_to_ptr.vmem [resolvable:$true] %s2239_s11 }
 0x260   : > { %s2992_s16 = scalar_lea.vmem %s5131_s11, 32  ;;  %s3065_s22 = smov [#allocation4]  }
 0x261   : > { %v2105_v14 = vadd.f32 %v2104_v36, %v4874_v30  ;;  %v2173_v21 = vadd.f32 %v2172_v26, %v2142_v15  ;;  %v2147_v30 = vmul.f32 %v4902_v34, %v4902_v34  ;;  %v2162_v26 = vmul.f32 %v5013_v3, %v5013_v3  ;;  %p2993_p1 = scmp.ne.s32.totalorder %s5131_s11, %s2992_s16  ;;  %s2996_s17 = sshll.u32 %s3065_s22, 4  ;;  %s2997_s17 = int_to_ptr.vmem [resolvable:$false] %s2996_s17 }
 0x262   : > { %s2998_s23 = scalar_lea.vmem %s2997_s17, 64  ;;  %p2999_p4 = scmp.lt.s32.totalorder %s5131_s11, %s2997_s17 }
 0x263   : > { %v2106_v39 = vadd.f32 %v2105_v14, %v4892_v19  ;;  %v2174_v47 = vadd.f32 %v2173_v21, %v2143_v49  ;;  %v2148_v19 = vmul.f32 %v4920_v24, %v4920_v24  ;;  %v2163_v49 = vmul.f32 %v5008_v0, %v5008_v0  ;;  %p2994_p2 = pnand %p2993_p1, %p3134_p5  ;;  %p3000_p7 = scmp.lt.s32.totalorder %s2998_s23, %s2992_s16 }
 0x265   : > { %v2107_v1 = vadd.f32 %v2106_v39, %v4888_v28  ;;  %v2175_v31 = vadd.f32 %v2174_v47, %v2144_v40  ;;  %v2149_v28 = vmul.f32 %v4916_v10, %v4916_v10  ;;  %p2995_p3 = pneg %p2994_p2  ;;  %p3001_p8 = por %p3000_p7, %p2999_p4 }
 0x267   : > { %v2108_v27 = vadd.f32 %v2107_v1, %v4906_v60  ;;  %v2176_v41 = vadd.f32 %v2175_v31, %v2145_v6  ;;  %v2150_v60 = vmul.f32 %v4933_v50, %v4933_v50  ;;  %p3002_p9 = pnand %p3001_p8, %p2995_p3 }
 0x269   : > { %v2109_v44 = vadd.f32 %v2108_v27, %v4902_v34  ;;  %v2177_v61 = vadd.f32 %v2176_v41, %v2146_v58  ;;  %v2151_v34 = vmul.f32 %v4928_v20, %v4928_v20 }
 0x26b   : > { %v2110_v43 = vadd.f32 %v2109_v44, %v4920_v24  ;;  %v2178_v9 = vadd.f32 %v2177_v61, %v2147_v30  ;;  %v2152_v24 = vmul.f32 %v4946_v45, %v4946_v45 }
 0x26d   : > { %v2111_v12 = vadd.f32 %v2110_v43, %v4916_v10  ;;  %v2179_v53 = vadd.f32 %v2178_v9, %v2148_v19  ;;  %v2153_v10 = vmul.f32 %v4941_v13, %v4941_v13 }
 0x26f   : > { %v2180_v32 = vadd.f32 %v2179_v53, %v2149_v28  ;;  %v2112_v38 = vadd.f32 %v2111_v12, %v4933_v50  ;;  %v2154_v50 = vmul.f32 %v4959_v62, %v4959_v62 }
 0x271   : > { %v2113_v59 = vadd.f32 %v2112_v38, %v4928_v20  ;;  %v2181_v63 = vadd.f32 %v2180_v32, %v2150_v60  ;;  %v2155_v20 = vmul.f32 %v4954_v16, %v4954_v16 }
 0x273   : > { %v2114_v57 = vadd.f32 %v2113_v59, %v4946_v45  ;;  %v2182_v23 = vadd.f32 %v2181_v63, %v2151_v34  ;;  %v2156_v45 = vmul.f32 %v4972_v2, %v4972_v2 }
 0x275   : > { %v2115_v18 = vadd.f32 %v2114_v57, %v4941_v13  ;;  %v2183_v46 = vadd.f32 %v2182_v23, %v2152_v24  ;;  %v2157_v13 = vmul.f32 %v4967_v25, %v4967_v25 }
 0x277   : > { %v2116_v37 = vadd.f32 %v2115_v18, %v4959_v62  ;;  %v2184_v5 = vadd.f32 %v2183_v46, %v2153_v10  ;;  %v2158_v62 = vmul.f32 %v4985_v22, %v4985_v22 }
 0x279   : > { %v2117_v17 = vadd.f32 %v2116_v37, %v4954_v16  ;;  %v2185_v42 = vadd.f32 %v2184_v5, %v2154_v50  ;;  %v2159_v16 = vmul.f32 %v4980_v51, %v4980_v51 }
 0x27b   : > { %v2118_v7 = vadd.f32 %v2117_v17, %v4972_v2  ;;  %v2186_v33 = vadd.f32 %v2185_v42, %v2155_v20  ;;  %v2160_v2 = vmul.f32 %v4998_v54, %v4998_v54 }
 0x27d   : > { %v2119_v8 = vadd.f32 %v2118_v7, %v4967_v25  ;;  %v2187_v35 = vadd.f32 %v2186_v33, %v2156_v45  ;;  %v2161_v25 = vmul.f32 %v4993_v11, %v4993_v11 }
 0x27f   : > { %v2120_v56 = vadd.f32 %v2119_v8, %v4985_v22  ;;  %v2188_v29 = vadd.f32 %v2187_v35, %v2157_v13 }
 0x281   : > { %v2121_v55 = vadd.f32 %v2120_v56, %v4980_v51  ;;  %v2189_v48 = vadd.f32 %v2188_v29, %v2158_v62 }
 0x283   : > { %v2122_v4 = vadd.f32 %v2121_v55, %v4998_v54  ;;  %v2190_v52 = vadd.f32 %v2189_v48, %v2159_v16 }
 0x285   : > { %v2123_v15 = vadd.f32 %v2122_v4, %v4993_v11  ;;  %v2191_v22 = vadd.f32 %v2190_v52, %v2160_v2 }
 0x287   : > { %v2124_v36 = vadd.f32 %v2123_v15, %v5013_v3  ;;  %v2192_v51 = vadd.f32 %v2191_v22, %v2161_v25 }
 0x289   : > { %v2125_v54 = vadd.f32 %v2124_v36, %v5008_v0  ;;  %v2193_v14 = vadd.f32 %v2192_v51, %v2162_v26 }
 0x28b   : > { %v2126_v21 = vrot.slane %v2125_v54, 4  ;;  %v2194_v40 = vadd.f32 %v2193_v14, %v2163_v49 }
 0x28d   : > { %v2127_v39 = vadd.f32 %v2126_v21, %v2125_v54  ;;  %v2195_v47 = vrot.slane %v2194_v40, 4 }
 0x28f   : > { %v2128_v6 = vrot.slane %v2127_v39, 2  ;;  %v2196_v11 = vadd.f32 %v2195_v47, %v2194_v40 }
 0x291   : > { %v2129_v1 = vadd.f32 %v2128_v6, %v2127_v39  ;;  %v2197_v31 = vrot.slane %v2196_v11, 2 }
 0x293   : > { %v2130_v58 = vrot.slane %v2129_v1, 1  ;;  %v2198_v3 = vadd.f32 %v2197_v31, %v2196_v11 }
 0x295   : > { %v2199_v27 = vrot.slane %v2198_v3, 1  ;;  %v2131_v0 = vadd.f32 %v2130_v58, %v2129_v1 }
 0x297   : > { %v2200_v41 = vadd.f32 %v2199_v27, %v2198_v3 }
 0x299   : > { %v2202_v30 = vsel %vm2201_vm4, %v2131_v0, %v2200_v41 }
 0x29a   : > { %2203 = vst [vmem:[%s228_s10] sm:$0x3] %v2202_v30 }
 0x29b   : > { %3005 = shalt.err (!%p3002_p9)
}
 0x29c   : > { %s3006_s9 = scalar_lea.hbm %s5129_s15, 32  ;;  %s3010_s6 = scalar_lea.hbm %s5177_s5, 64 }
 0x29d   : > { %p3007_p10 = scmp.ne.s32.totalorder %s5129_s15, %s3006_s9  ;;  %p3011_p13 = scmp.lt.u32.totalorder %s5129_s15, %s5177_s5 }
 0x29e   : > { %p3012_p0 = scmp.lt.u32.totalorder %s3010_s6, %s3006_s9  ;;  %p3014_p2 = scmp.lt.u32.totalorder %s3006_s9, %s5129_s15 }
 0x29f   : > { %p3008_p11 = pnand %p3007_p10, %p3134_p5 }
 0x2a0   : > { %p3013_p1 = por %p3012_p0, %p3011_p13 }
 0x2a1   : > { %p3009_p12 = pneg %p3008_p11 }
 0x2a2   : > { %p3015_p3 = por %p3014_p2, %p3013_p1 }
 0x2a4   : > { %p3016_p4 = pnand %p3015_p3, %p3009_p12 }
 0x2a6   : > { %3019 = shalt.err (!%p3016_p4)
}
 0x2a7   : > { %2915 = dma.vmem_to_hbm [thread:$0]  (%p3134_p5), %s5131_s11, 32, %s5129_s15, %s2210_s14  }
 0x2a8 PF: > { %p2925_p7 = scmp.ge.s32.totalorder %s3058_s21, 2  ;;  %s2251_s8 = sand.u32 1, %s3046_s18  }
 0x2a9   : > { %s2252_s10 = scalar_lea.sflag [#allocation3], %s2251_s8 }
 0x2aa   : > { %p2919_p8 = pnand %p2925_p7, %p3138_p6 }
 0x2ac   : > { %3037 = dma.done.wait (!%p2919_p8), %s2252_s10, 4096  }
 0x2ad   : > { %3039 = vsyncadd (!%p2919_p8), %s2252_s10, 4294963200  ;;  %s2261_s12 = scalar_lea.sflag [#allocation5], %s2251_s8 }
 0x2ae   : > { %3041 = dma.done.wait (!%p2919_p8), %s2261_s12, 32  }
 0x2af   : > { %3043 = vsyncadd (!%p2919_p8), %s2261_s12, 4294967264  ;;  %p19_p5 = scmp.ge.s32.totalorder %s3121_s24, 4   ;;  %s5391_s18 = smov %s3050_s19 }
 0x2b0   : > { %s5392_s19 = smov %s3054_s20  ;;  %s5393_s20 = smov %s3132_s27 }
 0x2b1   : > { %s5394_s21 = smov %s3121_s24  ;;  %21 = sbr.rel (!%p19_p5) target bundleno = 5 (0x5), region = 88 }
 0x2b8   :  { %2266 = vsyncpa [#allocation3], 1 }
 0x2b9   :  { %2268 = vsyncpa [#allocation3 + $0x1], 1 }
 0x2ba   :  { %2269 = vsyncpa [#allocation5], 1 }
 0x2bb   :  { %2271 = vsyncpa [#allocation5 + $0x1], 1 }

</bundles_post_ra>
